<compile_context>
chip_gen: v7x
topology: tpu7x:2x2x1
jax: 0.10.0
libtpu: 0.0.40
codegen_flags: <defaults>
</compile_context>

<pallas_src>
import functools

import jax
import jax.numpy as jnp
from jax.experimental import pallas as pl
from jax.experimental.pallas import tpu as pltpu


_VMEM = pl.BlockSpec(memory_space=pltpu.MemorySpace.VMEM)


# ----------------------------------------------------------------------------
# In-kernel helpers (operate on values already resident in vregs)
# ----------------------------------------------------------------------------

def _layernorm(x, g, b, eps=1e-5):
    # Single-pass E[x^2] - E[x]^2 form: the two reductions are independent
    # (no serialized second pass over (x - mean)); rsqrt runs on the EUP slot.
    mean = jnp.mean(x, axis=-1, keepdims=True)
    msq = jnp.mean(x * x, axis=-1, keepdims=True)
    var = msq - mean * mean
    return (x - mean) * jax.lax.rsqrt(var + eps) * g + b


def _kth_largest(x, k):
    """Per-row k-th largest value (assumes no exact duplicates in the top-k).

    Simplified per perf review: each pass removes every occurrence of the
    running row max (1 XLU reduce + 1 select per pass instead of 2 reduces +
    2 selects).  Rows with exact float ties among the top-k may keep extra
    entries — softmax outputs essentially never tie.
    """
    cur = x
    for _ in range(max(int(k) - 1, 0)):
        m = jnp.max(cur, axis=-1, keepdims=True)
        cur = jnp.where(cur >= m, -jnp.inf, cur)
    return jnp.max(cur, axis=-1, keepdims=True)


def _mask_topk(x, k):
    # torch.topk-style threshold mask: keep entries >= the k-th largest per row.
    kth = _kth_largest(x, k)
    return x * (x >= kth).astype(x.dtype)


# ----------------------------------------------------------------------------
# Fully fused forward kernel
# ----------------------------------------------------------------------------

def _hgnn_classifier_kernel(
    # inputs
    fts_ref, noise_ref,
    bbw0_ref, bbw12_ref, bbb_ref,
    vecs_ref, qkvw_ref, m0w_ref, m0b_ref, m1w_ref, ctw_ref,
    clsw_ref, clsb_ref,
    # outputs
    xcat_ref, aux_ref,
    *, conv_number, scale, k_n, k_e, eps, transfer):
    f32 = jnp.float32
    d = bbw0_ref.shape[1]           # hidden width
    n_s = noise_ref.shape[1]        # number of hyperedges
    out_dim = clsb_ref.shape[1]

    # ---- linear backbone: relu(L0) -> relu(L1) -> L2 (all in vregs) ----
    x = jnp.maximum(jnp.dot(fts_ref[...], bbw0_ref[...],
                            preferred_element_type=f32) + bbb_ref[0:1, :], 0.0)
    x = jnp.maximum(jnp.dot(x, bbw12_ref[:, :d],
                            preferred_element_type=f32) + bbb_ref[1:2, :], 0.0)
    x = jnp.dot(x, bbw12_ref[:, d:], preferred_element_type=f32) + bbb_ref[2:3, :]

    for i in range(conv_number):
        # Packed per-conv params (few big DMAs, sliced statically: zero cost).
        vecs = vecs_ref[i]                                   # (12, d)
        e_mu, e_logsig = vecs[0:1], vecs[1:2]
        g_in, b_in = vecs[2:3], vecs[3:4]
        g_ed, b_ed = vecs[4:5], vecs[5:6]
        q_b, k_b, v_b = vecs[6:7], vecs[7:8], vecs[8:9]
        m1_b, c_b, t_b = vecs[9:10], vecs[10:11], vecs[11:12]
        qkv_w = qkvw_ref[i]                                  # (d, 3d) = [q|k|v]
        m0_w = m0w_ref[i]                                    # (2d, mh)
        ct_w = ctw_ref[i]                                    # (d, 2d) = [conv|transfer]

        # --- HConstructor (iters=1, fresh edge sample, eval stage) ---
        edges = e_mu + jnp.exp(e_logsig) * noise_ref[i]      # (n_s, d)

        xin = _layernorm(x, g_in, b_in)                      # (n, d)
        # Fused q|k|v node projection: one (n,d)x(d,3d) MXU push.
        xin_qkv = jnp.dot(xin, qkv_w, preferred_element_type=f32)
        q_node = xin_qkv[:, :d] + q_b                        # no ReLU (matches torch)
        k_feat = jnp.maximum(xin_qkv[:, d:2 * d] + k_b, 0.0)
        v_feat = jnp.maximum(xin_qkv[:, 2 * d:] + v_b, 0.0)

        edges_n = _layernorm(edges, g_ed, b_ed)              # (n_s, d)
        q_edge = jnp.maximum(
            jnp.dot(edges_n, qkv_w[:, :d], preferred_element_type=f32) + q_b, 0.0)

        # Edge-side attention over nodes: q_e @ k_n^T (no materialized k.T).
        dots = jax.lax.dot_general(q_edge, k_feat, (((1,), (1,)), ((), ())),
                                   preferred_element_type=f32) * scale   # (n_s, n)
        ncols = dots.shape[-1]
        mx1 = jnp.max(dots, axis=-1, keepdims=True)
        e1 = jnp.exp(dots - mx1)
        s1 = jnp.sum(e1, axis=-1, keepdims=True)
        # softmax + eps then row renorm, folded into one EUP reciprocal:
        #   (e/s + eps) / (1 + ncols*eps) == (e + eps*s) / (s * (1 + ncols*eps))
        attn = (e1 + eps * s1) * pl.reciprocal(s1 * (1.0 + ncols * eps), approx=True)
        attn = _mask_topk(attn, k_n)
        updates = jnp.dot(attn, v_feat, preferred_element_type=f32)       # (n_s, d)

        # mlp(cat(edges_n, updates)): first-layer weight split -> no concat.
        h = (jnp.dot(edges_n, m0_w[:d], preferred_element_type=f32)
             + jnp.dot(updates, m0_w[d:], preferred_element_type=f32)
             + m0b_ref[i])
        h = jnp.maximum(h, 0.0)                              # (n_s, mh)
        edges_out = jnp.dot(h, m1w_ref[i], preferred_element_type=f32) + m1_b

        # Node-side attention over edges -> incidence H.
        k_edge = jnp.maximum(
            jnp.dot(edges_out, qkv_w[:, d:2 * d], preferred_element_type=f32) + k_b, 0.0)
        dots2 = jax.lax.dot_general(q_node, k_edge, (((1,), (1,)), ((), ())),
                                    preferred_element_type=f32) * scale    # (n, n_s)
        mx2 = jnp.max(dots2, axis=-1, keepdims=True)
        e2 = jnp.exp(dots2 - mx2)
        attn_v = e2 * pl.reciprocal(jnp.sum(e2, axis=-1, keepdims=True), approx=True)
        H = _mask_topk(attn_v, k_e)

        # TODO(synk): ajust_edges / saturation-level print are train-time Python
        # side effects (dynamic num_edges + I/O); not representable in a kernel.

        # --- HGNN_conv: edges @ W + b ; nodes = H @ edges ; residual ---
        edges_w = jnp.dot(edges_out, ct_w[:, :d], preferred_element_type=f32) + c_b
        nodes = jnp.dot(H, edges_w, preferred_element_type=f32)            # (n, d)
        x = jnp.maximum(x + nodes, 0.0)      # residual + classifier-loop ReLU
        # F.dropout(training=False) -> identity.
        if transfer:
            x = jnp.maximum(
                jnp.dot(x, ct_w[:, d:], preferred_element_type=f32) + t_b, 0.0)

        # Pack per-conv outputs into the output slabs (stay in VMEM).
        xcat_ref[:, i * d:(i + 1) * d] = x
        off = out_dim + 2 * i * n_s
        aux_ref[:, off:off + n_s] = H
        aux_ref[:, off + n_s:off + 2 * n_s] = dots2

    # Classifier: single K = conv_number*d matmul on the in-VMEM concatenation.
    logits = jnp.dot(xcat_ref[...], clsw_ref[...],
                     preferred_element_type=f32) + clsb_ref[...]
    aux_ref[:, :out_dim] = logits


# ----------------------------------------------------------------------------
# Wrapper
# ----------------------------------------------------------------------------

def hgnn_classifier_forward(packed, fts, noises, *, conv_number, k_n, k_e,
                            transfer=1, eps=1e-8):
    n = fts.shape[0]
    hid = packed["bb_w0"].shape[1]
    n_s = noises.shape[1]
    out_dim = packed["cls_b"].shape[1]
    scale = float(hid) ** (-0.5)
    aux_cols = out_dim + conv_number * 2 * n_s

    kern = functools.partial(
        _hgnn_classifier_kernel, conv_number=int(conv_number), scale=scale,
        k_n=int(k_n), k_e=int(k_e), eps=float(eps), transfer=bool(transfer))

    # TODO(synk): at realistic n_nodes, tile the node axis with a grid
    # (dimension_semantics=("parallel",) for the node-side phase), cast MXU
    # operands to bf16 on v6e/v7x, and re-derive tiles for v7x's 64 MiB VMEM.
    xcat, aux = pl.pallas_call(
        kern,
        out_shape=(jax.ShapeDtypeStruct((n, conv_number * hid), jnp.float32),
                   jax.ShapeDtypeStruct((n, aux_cols), jnp.float32)),
        in_specs=[_VMEM] * 13,
        out_specs=(_VMEM, _VMEM),
    )(fts, noises,
      packed["bb_w0"], packed["bb_w12"], packed["bb_b"],
      packed["conv_vecs"], packed["conv_qkv_w"], packed["conv_mlp0_w"],
      packed["conv_mlp0_b"], packed["conv_mlp1_w"], packed["conv_ct_w"],
      packed["cls_w"], packed["cls_b"])

    out = aux[:, :out_dim]
    Hs, Hraws = [], []
    for i in range(conv_number):
        off = out_dim + 2 * i * n_s
        Hs.append(aux[:, off:off + n_s])
        Hraws.append(aux[:, off + n_s:off + 2 * n_s])
    return out, xcat, Hs, Hraws


# ----------------------------------------------------------------------------
# Deterministic parameter initialization (synthetic, shapes from __init__)
# ----------------------------------------------------------------------------

def _linear_init(key, fin, fout):
    kw, kb = jax.random.split(key)
    bound = 1.0 / (fin ** 0.5)
    w = jax.random.uniform(kw, (fin, fout), jnp.float32, -bound, bound)
    b = jax.random.uniform(kb, (1, fout), jnp.float32, -bound, bound)
    return w, b


def init_params(key, in_dim, hid_dim, out_dim, num_edges, conv_number):
    d = hid_dim
    mlp_hidden = max(d, 128)
    keys = jax.random.split(key, 8 + conv_number)

    p = {}
    p["lb0_w"], p["lb0_b"] = _linear_init(keys[0], in_dim, hid_dim)
    p["lb1_w"], p["lb1_b"] = _linear_init(keys[1], hid_dim, hid_dim)
    p["lb2_w"], p["lb2_b"] = _linear_init(keys[2], hid_dim, hid_dim)
    p["cls_w"], p["cls_b"] = _linear_init(keys[3], conv_number * hid_dim, out_dim)

    convs = []
    for i in range(conv_number):
        ck = jax.random.split(keys[4 + i], 10)
        hc = {
            "edges_mu": jax.random.normal(ck[0], (1, d), jnp.float32),
            "edges_logsigma": 0.1 * jax.random.normal(ck[1], (1, d), jnp.float32),
            "norm_input_g": jnp.ones((1, d), jnp.float32),
            "norm_input_b": jnp.zeros((1, d), jnp.float32),
            "norm_edgs_g": jnp.ones((1, d), jnp.float32),
            "norm_edgs_b": jnp.zeros((1, d), jnp.float32),
        }
        hc["to_q_w"], hc["to_q_b"] = _linear_init(ck[2], d, d)
        hc["to_k_w"], hc["to_k_b"] = _linear_init(ck[3], d, d)
        hc["to_v_w"], hc["to_v_b"] = _linear_init(ck[4], d, d)
        hc["mlp0_w"], hc["mlp0_b"] = _linear_init(ck[5], 2 * d, mlp_hidden)
        hc["mlp1_w"], hc["mlp1_b"] = _linear_init(ck[6], mlp_hidden, d)

        w, b = _linear_init(ck[7], d, d)      # HGNN_conv.weight / bias
        tw, tb = _linear_init(ck[8], d, d)    # transfer linear
        convs.append({"hc": hc, "weight": w, "bias": b, "t_w": tw, "t_b": tb})

    p["convs"] = convs
    return p


def pack_params(p):
    """Host-side packing: few large slabs instead of ~50 tiny kernel inputs."""
    packed = {
        "bb_w0": p["lb0_w"],
        "bb_w12": jnp.concatenate([p["lb1_w"], p["lb2_w"]], axis=1),
        "bb_b": jnp.concatenate([p["lb0_b"], p["lb1_b"], p["lb2_b"]], axis=0),
        "cls_w": p["cls_w"],
        "cls_b": p["cls_b"],
    }
    vecs, qkv, m0w, m0b, m1w, ctw = [], [], [], [], [], []
    for cp in p["convs"]:
        hc = cp["hc"]
        vecs.append(jnp.concatenate([
            hc["edges_mu"], hc["edges_logsigma"],
            hc["norm_input_g"], hc["norm_input_b"],
            hc["norm_edgs_g"], hc["norm_edgs_b"],
            hc["to_q_b"], hc["to_k_b"], hc["to_v_b"],
            hc["mlp1_b"], cp["bias"], cp["t_b"]], axis=0))         # (12, d)
        qkv.append(jnp.concatenate([hc["to_q_w"], hc["to_k_w"], hc["to_v_w"]],
                                   axis=1))                        # (d, 3d)
        m0w.append(hc["mlp0_w"])                                   # (2d, mh)
        m0b.append(hc["mlp0_b"])                                   # (1, mh)
        m1w.append(hc["mlp1_w"])                                   # (mh, d)
        ctw.append(jnp.concatenate([cp["weight"], cp["t_w"]], axis=1))  # (d, 2d)
    packed["conv_vecs"] = jnp.stack(vecs)
    packed["conv_qkv_w"] = jnp.stack(qkv)
    packed["conv_mlp0_w"] = jnp.stack(m0w)
    packed["conv_mlp0_b"] = jnp.stack(m0b)
    packed["conv_mlp1_w"] = jnp.stack(m1w)
    packed["conv_ct_w"] = jnp.stack(ctw)
    return packed


# ----------------------------------------------------------------------------
# Main
# ----------------------------------------------------------------------------

if __name__ == "__main__":
    # args (small, consistent with the module)
    in_dim, hid_dim, out_dim = 16, 32, 4
    num_edges, conv_number = 8, 2
    n_nodes = 16
    k_n, k_e = 4, 2            # args.k_n, args.k_e

    root = jax.random.PRNGKey(0)
    k_param, k_fts, k_noise = jax.random.split(root, 3)

    params = init_params(k_param, in_dim, hid_dim, out_dim, num_edges, conv_number)
    packed = pack_params(params)   # packed once, outside jit
    fts = jax.random.normal(k_fts, (n_nodes, in_dim), jnp.float32)
    # per-conv Gaussian noise used to sample the hyperedge embeddings
    noises = jax.random.normal(k_noise, (conv_number, num_edges, hid_dim), jnp.float32)

    fwd = jax.jit(functools.partial(hgnn_classifier_forward,
                                    conv_number=conv_number,
                                    k_n=k_n, k_e=k_e, transfer=1))
    out, xcat, Hs, Hraws = fwd(packed, fts, noises)
    jax.block_until_ready((out, xcat, Hs, Hraws))

    assert out.shape == (n_nodes, out_dim)
    assert xcat.shape == (n_nodes, conv_number * hid_dim)
    assert all(h.shape == (n_nodes, num_edges) for h in Hs)
    assert all(hr.shape == (n_nodes, num_edges) for hr in Hraws)
    assert bool(jnp.all(jnp.isfinite(out)))
    assert bool(jnp.all(jnp.isfinite(xcat)))
    assert all(bool(jnp.all(jnp.isfinite(h))) for h in Hs)
    assert all(bool(jnp.all(jnp.isfinite(hr))) for hr in Hraws)

    print("KERNEL_OK")
</pallas_src>

<mosaic_0001>
module attributes {stable_mosaic.version = 11 : i64} {
  func.func @_hgnn_classifier_kernel(%arg0: memref<16x16xf32, #tpu.memory_space<vmem>>, %arg1: memref<2x8x32xf32, #tpu.memory_space<vmem>>, %arg2: memref<16x32xf32, #tpu.memory_space<vmem>>, %arg3: memref<32x64xf32, #tpu.memory_space<vmem>>, %arg4: memref<3x32xf32, #tpu.memory_space<vmem>>, %arg5: memref<2x12x32xf32, #tpu.memory_space<vmem>>, %arg6: memref<2x32x96xf32, #tpu.memory_space<vmem>>, %arg7: memref<2x64x128xf32, #tpu.memory_space<vmem>>, %arg8: memref<2x1x128xf32, #tpu.memory_space<vmem>>, %arg9: memref<2x128x32xf32, #tpu.memory_space<vmem>>, %arg10: memref<2x32x64xf32, #tpu.memory_space<vmem>>, %arg11: memref<64x4xf32, #tpu.memory_space<vmem>>, %arg12: memref<1x4xf32, #tpu.memory_space<vmem>>, %arg13: memref<16x64xf32, #tpu.memory_space<vmem>>, %arg14: memref<16x36xf32, #tpu.memory_space<vmem>>) attributes {dimension_semantics = [], scalar_prefetch = 0 : i64, scratch_operands = 0 : i64, tpu.core_type = #tpu.core_type<tc>} {
    %c0 = arith.constant 0 : index
    %c0_0 = arith.constant 0 : index
    %0 = vector.load %arg0[%c0, %c0_0] : memref<16x16xf32, #tpu.memory_space<vmem>>, vector<16x16xf32>
    %c0_1 = arith.constant 0 : index
    %c0_2 = arith.constant 0 : index
    %1 = vector.load %arg2[%c0_1, %c0_2] : memref<16x32xf32, #tpu.memory_space<vmem>>, vector<16x32xf32>
    %cst = arith.constant dense<0.000000e+00> : vector<16x32xf32>
    %2 = tpu.matmul %0, %1, %cst {dimension_numbers = #tpu.dot_dimension_numbers<[1], [0], [0], [1], [0, 0, 1, 1], [], []>} : vector<16x16xf32>, vector<16x32xf32>, vector<16x32xf32> -> vector<16x32xf32>
    %c0_3 = arith.constant 0 : index
    %c0_4 = arith.constant 0 : index
    %3 = vector.load %arg4[%c0_3, %c0_4] : memref<3x32xf32, #tpu.memory_space<vmem>>, vector<1x32xf32>
    %4 = vector.broadcast %3 : vector<1x32xf32> to vector<16x32xf32>
    %5 = arith.addf %2, %4 : vector<16x32xf32>
    %cst_5 = arith.constant 0.000000e+00 : f32
    %6 = vector.broadcast %cst_5 : f32 to vector<16x32xf32>
    %7 = arith.maximumf %5, %6 : vector<16x32xf32>
    %c0_6 = arith.constant 0 : index
    %c0_7 = arith.constant 0 : index
    %8 = vector.load %arg3[%c0_6, %c0_7] : memref<32x64xf32, #tpu.memory_space<vmem>>, vector<32x32xf32>
    %cst_8 = arith.constant dense<0.000000e+00> : vector<16x32xf32>
    %9 = tpu.matmul %7, %8, %cst_8 {dimension_numbers = #tpu.dot_dimension_numbers<[1], [0], [0], [1], [0, 0, 1, 1], [], []>} : vector<16x32xf32>, vector<32x32xf32>, vector<16x32xf32> -> vector<16x32xf32>
    %c1 = arith.constant 1 : index
    %c0_9 = arith.constant 0 : index
    %10 = vector.load %arg4[%c1, %c0_9] : memref<3x32xf32, #tpu.memory_space<vmem>>, vector<1x32xf32>
    %11 = vector.broadcast %10 : vector<1x32xf32> to vector<16x32xf32>
    %12 = arith.addf %9, %11 : vector<16x32xf32>
    %cst_10 = arith.constant 0.000000e+00 : f32
    %13 = vector.broadcast %cst_10 : f32 to vector<16x32xf32>
    %14 = arith.maximumf %12, %13 : vector<16x32xf32>
    %c0_11 = arith.constant 0 : index
    %c32 = arith.constant 32 : index
    %15 = vector.load %arg3[%c0_11, %c32] : memref<32x64xf32, #tpu.memory_space<vmem>>, vector<32x32xf32>
    %cst_12 = arith.constant dense<0.000000e+00> : vector<16x32xf32>
    %16 = tpu.matmul %14, %15, %cst_12 {dimension_numbers = #tpu.dot_dimension_numbers<[1], [0], [0], [1], [0, 0, 1, 1], [], []>} : vector<16x32xf32>, vector<32x32xf32>, vector<16x32xf32> -> vector<16x32xf32>
    %c2 = arith.constant 2 : index
    %c0_13 = arith.constant 0 : index
    %17 = vector.load %arg4[%c2, %c0_13] : memref<3x32xf32, #tpu.memory_space<vmem>>, vector<1x32xf32>
    %18 = vector.broadcast %17 : vector<1x32xf32> to vector<16x32xf32>
    %19 = arith.addf %16, %18 : vector<16x32xf32>
    %c0_14 = arith.constant 0 : index
    %c0_15 = arith.constant 0 : index
    %c0_16 = arith.constant 0 : index
    %20 = vector.load %arg5[%c0_14, %c0_15, %c0_16] : memref<2x12x32xf32, #tpu.memory_space<vmem>>, vector<1x12x32xf32>
    %21 = vector.shape_cast %20 : vector<1x12x32xf32> to vector<12x32xf32>
    %22 = vector.extract_strided_slice %21 {offsets = [0, 0], sizes = [1, 32], strides = [1, 1]} : vector<12x32xf32> to vector<1x32xf32>
    %23 = vector.extract_strided_slice %21 {offsets = [1, 0], sizes = [1, 32], strides = [1, 1]} : vector<12x32xf32> to vector<1x32xf32>
    %24 = vector.extract_strided_slice %21 {offsets = [2, 0], sizes = [1, 32], strides = [1, 1]} : vector<12x32xf32> to vector<1x32xf32>
    %25 = vector.extract_strided_slice %21 {offsets = [3, 0], sizes = [1, 32], strides = [1, 1]} : vector<12x32xf32> to vector<1x32xf32>
    %26 = vector.extract_strided_slice %21 {offsets = [4, 0], sizes = [1, 32], strides = [1, 1]} : vector<12x32xf32> to vector<1x32xf32>
    %27 = vector.extract_strided_slice %21 {offsets = [5, 0], sizes = [1, 32], strides = [1, 1]} : vector<12x32xf32> to vector<1x32xf32>
    %28 = vector.extract_strided_slice %21 {offsets = [6, 0], sizes = [1, 32], strides = [1, 1]} : vector<12x32xf32> to vector<1x32xf32>
    %29 = vector.extract_strided_slice %21 {offsets = [7, 0], sizes = [1, 32], strides = [1, 1]} : vector<12x32xf32> to vector<1x32xf32>
    %30 = vector.extract_strided_slice %21 {offsets = [8, 0], sizes = [1, 32], strides = [1, 1]} : vector<12x32xf32> to vector<1x32xf32>
    %31 = vector.extract_strided_slice %21 {offsets = [9, 0], sizes = [1, 32], strides = [1, 1]} : vector<12x32xf32> to vector<1x32xf32>
    %32 = vector.extract_strided_slice %21 {offsets = [10, 0], sizes = [1, 32], strides = [1, 1]} : vector<12x32xf32> to vector<1x32xf32>
    %33 = vector.extract_strided_slice %21 {offsets = [11, 0], sizes = [1, 32], strides = [1, 1]} : vector<12x32xf32> to vector<1x32xf32>
    %c0_17 = arith.constant 0 : index
    %c0_18 = arith.constant 0 : index
    %c0_19 = arith.constant 0 : index
    %34 = vector.load %arg6[%c0_17, %c0_18, %c0_19] : memref<2x32x96xf32, #tpu.memory_space<vmem>>, vector<1x32x96xf32>
    %35 = vector.shape_cast %34 : vector<1x32x96xf32> to vector<32x96xf32>
    %c0_20 = arith.constant 0 : index
    %c0_21 = arith.constant 0 : index
    %c0_22 = arith.constant 0 : index
    %36 = vector.load %arg7[%c0_20, %c0_21, %c0_22] : memref<2x64x128xf32, #tpu.memory_space<vmem>>, vector<1x64x128xf32>
    %37 = vector.shape_cast %36 : vector<1x64x128xf32> to vector<64x128xf32>
    %c0_23 = arith.constant 0 : index
    %c0_24 = arith.constant 0 : index
    %c0_25 = arith.constant 0 : index
    %38 = vector.load %arg10[%c0_23, %c0_24, %c0_25] : memref<2x32x64xf32, #tpu.memory_space<vmem>>, vector<1x32x64xf32>
    %39 = vector.shape_cast %38 : vector<1x32x64xf32> to vector<32x64xf32>
    %40 = math.exp %23 : vector<1x32xf32>
    %c0_26 = arith.constant 0 : index
    %c0_27 = arith.constant 0 : index
    %c0_28 = arith.constant 0 : index
    %41 = vector.load %arg1[%c0_26, %c0_27, %c0_28] : memref<2x8x32xf32, #tpu.memory_space<vmem>>, vector<1x8x32xf32>
    %42 = vector.shape_cast %41 : vector<1x8x32xf32> to vector<8x32xf32>
    %43 = vector.broadcast %40 : vector<1x32xf32> to vector<8x32xf32>
    %44 = arith.mulf %43, %42 : vector<8x32xf32>
    %45 = vector.broadcast %22 : vector<1x32xf32> to vector<8x32xf32>
    %46 = arith.addf %45, %44 : vector<8x32xf32>
    %cst_29 = arith.constant dense<0.000000e+00> : vector<16xf32>
    %47 = vector.multi_reduction <add>, %19, %cst_29 [1] : vector<16x32xf32> to vector<16xf32>
    %48 = vector.shape_cast %47 : vector<16xf32> to vector<16x1xf32>
    %cst_30 = arith.constant 3.200000e+01 : f32
    %49 = vector.broadcast %cst_30 : f32 to vector<16x1xf32>
    %50 = arith.divf %48, %49 : vector<16x1xf32>
    %51 = arith.mulf %19, %19 : vector<16x32xf32>
    %cst_31 = arith.constant dense<0.000000e+00> : vector<16xf32>
    %52 = vector.multi_reduction <add>, %51, %cst_31 [1] : vector<16x32xf32> to vector<16xf32>
    %53 = vector.shape_cast %52 : vector<16xf32> to vector<16x1xf32>
    %cst_32 = arith.constant 3.200000e+01 : f32
    %54 = vector.broadcast %cst_32 : f32 to vector<16x1xf32>
    %55 = arith.divf %53, %54 : vector<16x1xf32>
    %56 = arith.mulf %50, %50 : vector<16x1xf32>
    %57 = arith.subf %55, %56 : vector<16x1xf32>
    %58 = vector.broadcast %50 : vector<16x1xf32> to vector<16x32xf32>
    %59 = arith.subf %19, %58 : vector<16x32xf32>
    %cst_33 = arith.constant 9.99999974E-6 : f32
    %60 = vector.broadcast %cst_33 : f32 to vector<16x1xf32>
    %61 = arith.addf %57, %60 : vector<16x1xf32>
    %62 = math.rsqrt %61 : vector<16x1xf32>
    %63 = vector.broadcast %62 : vector<16x1xf32> to vector<16x32xf32>
    %64 = arith.mulf %59, %63 : vector<16x32xf32>
    %65 = vector.broadcast %24 : vector<1x32xf32> to vector<16x32xf32>
    %66 = arith.mulf %64, %65 : vector<16x32xf32>
    %67 = vector.broadcast %25 : vector<1x32xf32> to vector<16x32xf32>
    %68 = arith.addf %66, %67 : vector<16x32xf32>
    %cst_34 = arith.constant dense<0.000000e+00> : vector<16x96xf32>
    %69 = tpu.matmul %68, %35, %cst_34 {dimension_numbers = #tpu.dot_dimension_numbers<[1], [0], [0], [1], [0, 0, 1, 1], [], []>} : vector<16x32xf32>, vector<32x96xf32>, vector<16x96xf32> -> vector<16x96xf32>
    %70 = vector.extract_strided_slice %69 {offsets = [0, 0], sizes = [16, 32], strides = [1, 1]} : vector<16x96xf32> to vector<16x32xf32>
    %71 = vector.broadcast %28 : vector<1x32xf32> to vector<16x32xf32>
    %72 = arith.addf %70, %71 : vector<16x32xf32>
    %73 = vector.extract_strided_slice %69 {offsets = [0, 32], sizes = [16, 32], strides = [1, 1]} : vector<16x96xf32> to vector<16x32xf32>
    %74 = vector.broadcast %29 : vector<1x32xf32> to vector<16x32xf32>
    %75 = arith.addf %73, %74 : vector<16x32xf32>
    %cst_35 = arith.constant 0.000000e+00 : f32
    %76 = vector.broadcast %cst_35 : f32 to vector<16x32xf32>
    %77 = arith.maximumf %75, %76 : vector<16x32xf32>
    %78 = vector.extract_strided_slice %69 {offsets = [0, 64], sizes = [16, 32], strides = [1, 1]} : vector<16x96xf32> to vector<16x32xf32>
    %79 = vector.broadcast %30 : vector<1x32xf32> to vector<16x32xf32>
    %80 = arith.addf %78, %79 : vector<16x32xf32>
    %cst_36 = arith.constant 0.000000e+00 : f32
    %81 = vector.broadcast %cst_36 : f32 to vector<16x32xf32>
    %82 = arith.maximumf %80, %81 : vector<16x32xf32>
    %cst_37 = arith.constant dense<0.000000e+00> : vector<8xf32>
    %83 = vector.multi_reduction <add>, %46, %cst_37 [1] : vector<8x32xf32> to vector<8xf32>
    %84 = vector.shape_cast %83 : vector<8xf32> to vector<8x1xf32>
    %cst_38 = arith.constant 3.200000e+01 : f32
    %85 = vector.broadcast %cst_38 : f32 to vector<8x1xf32>
    %86 = arith.divf %84, %85 : vector<8x1xf32>
    %87 = arith.mulf %46, %46 : vector<8x32xf32>
    %cst_39 = arith.constant dense<0.000000e+00> : vector<8xf32>
    %88 = vector.multi_reduction <add>, %87, %cst_39 [1] : vector<8x32xf32> to vector<8xf32>
    %89 = vector.shape_cast %88 : vector<8xf32> to vector<8x1xf32>
    %cst_40 = arith.constant 3.200000e+01 : f32
    %90 = vector.broadcast %cst_40 : f32 to vector<8x1xf32>
    %91 = arith.divf %89, %90 : vector<8x1xf32>
    %92 = arith.mulf %86, %86 : vector<8x1xf32>
    %93 = arith.subf %91, %92 : vector<8x1xf32>
    %94 = vector.broadcast %86 : vector<8x1xf32> to vector<8x32xf32>
    %95 = arith.subf %46, %94 : vector<8x32xf32>
    %cst_41 = arith.constant 9.99999974E-6 : f32
    %96 = vector.broadcast %cst_41 : f32 to vector<8x1xf32>
    %97 = arith.addf %93, %96 : vector<8x1xf32>
    %98 = math.rsqrt %97 : vector<8x1xf32>
    %99 = vector.broadcast %98 : vector<8x1xf32> to vector<8x32xf32>
    %100 = arith.mulf %95, %99 : vector<8x32xf32>
    %101 = vector.broadcast %26 : vector<1x32xf32> to vector<8x32xf32>
    %102 = arith.mulf %100, %101 : vector<8x32xf32>
    %103 = vector.broadcast %27 : vector<1x32xf32> to vector<8x32xf32>
    %104 = arith.addf %102, %103 : vector<8x32xf32>
    %105 = vector.extract_strided_slice %35 {offsets = [0, 0], sizes = [32, 32], strides = [1, 1]} : vector<32x96xf32> to vector<32x32xf32>
    %cst_42 = arith.constant dense<0.000000e+00> : vector<8x32xf32>
    %106 = tpu.matmul %104, %105, %cst_42 {dimension_numbers = #tpu.dot_dimension_numbers<[1], [0], [0], [1], [0, 0, 1, 1], [], []>} : vector<8x32xf32>, vector<32x32xf32>, vector<8x32xf32> -> vector<8x32xf32>
    %107 = vector.broadcast %28 : vector<1x32xf32> to vector<8x32xf32>
    %108 = arith.addf %106, %107 : vector<8x32xf32>
    %cst_43 = arith.constant 0.000000e+00 : f32
    %109 = vector.broadcast %cst_43 : f32 to vector<8x32xf32>
    %110 = arith.maximumf %108, %109 : vector<8x32xf32>
    %cst_44 = arith.constant dense<0.000000e+00> : vector<8x16xf32>
    %111 = tpu.matmul %110, %77, %cst_44 {dimension_numbers = #tpu.dot_dimension_numbers<[1], [1], [0], [0], [0, 0, 1, 0], [], []>} : vector<8x32xf32>, vector<16x32xf32>, vector<8x16xf32> -> vector<8x16xf32>
    %cst_45 = arith.constant 0.176776692 : f32
    %112 = vector.broadcast %cst_45 : f32 to vector<8x16xf32>
    %113 = arith.mulf %111, %112 : vector<8x16xf32>
    %cst_46 = arith.constant dense<0xFF800000> : vector<8xf32>
    %114 = vector.multi_reduction <maximumf>, %113, %cst_46 [1] : vector<8x16xf32> to vector<8xf32>
    %115 = vector.shape_cast %114 : vector<8xf32> to vector<8x1xf32>
    %116 = vector.broadcast %115 : vector<8x1xf32> to vector<8x16xf32>
    %117 = arith.subf %113, %116 : vector<8x16xf32>
    %118 = math.exp %117 : vector<8x16xf32>
    %cst_47 = arith.constant dense<0.000000e+00> : vector<8xf32>
    %119 = vector.multi_reduction <add>, %118, %cst_47 [1] : vector<8x16xf32> to vector<8xf32>
    %120 = vector.shape_cast %119 : vector<8xf32> to vector<8x1xf32>
    %cst_48 = arith.constant 9.99999993E-9 : f32
    %121 = vector.broadcast %cst_48 : f32 to vector<8x1xf32>
    %122 = arith.mulf %121, %120 : vector<8x1xf32>
    %123 = vector.broadcast %122 : vector<8x1xf32> to vector<8x16xf32>
    %124 = arith.addf %118, %123 : vector<8x16xf32>
    %cst_49 = arith.constant 1.00000012 : f32
    %125 = vector.broadcast %cst_49 : f32 to vector<8x1xf32>
    %126 = arith.mulf %120, %125 : vector<8x1xf32>
    %127 = tpu.reciprocal %126 {approx = true} : vector<8x1xf32> -> vector<8x1xf32>
    %128 = vector.broadcast %127 : vector<8x1xf32> to vector<8x16xf32>
    %129 = arith.mulf %124, %128 : vector<8x16xf32>
    %cst_50 = arith.constant dense<0xFF800000> : vector<8xf32>
    %130 = vector.multi_reduction <maximumf>, %129, %cst_50 [1] : vector<8x16xf32> to vector<8xf32>
    %131 = vector.shape_cast %130 : vector<8xf32> to vector<8x1xf32>
    %132 = vector.broadcast %131 : vector<8x1xf32> to vector<8x16xf32>
    %133 = arith.cmpf oge, %129, %132 : vector<8x16xf32>
    %cst_51 = arith.constant 0xFF800000 : f32
    %134 = vector.broadcast %cst_51 : f32 to vector<8x16xf32>
    %135 = arith.select %133, %134, %129 : vector<8x16xi1>, vector<8x16xf32>
    %cst_52 = arith.constant dense<0xFF800000> : vector<8xf32>
    %136 = vector.multi_reduction <maximumf>, %135, %cst_52 [1] : vector<8x16xf32> to vector<8xf32>
    %137 = vector.shape_cast %136 : vector<8xf32> to vector<8x1xf32>
    %138 = vector.broadcast %137 : vector<8x1xf32> to vector<8x16xf32>
    %139 = arith.cmpf oge, %135, %138 : vector<8x16xf32>
    %cst_53 = arith.constant 0xFF800000 : f32
    %140 = vector.broadcast %cst_53 : f32 to vector<8x16xf32>
    %141 = arith.select %139, %140, %135 : vector<8x16xi1>, vector<8x16xf32>
    %cst_54 = arith.constant dense<0xFF800000> : vector<8xf32>
    %142 = vector.multi_reduction <maximumf>, %141, %cst_54 [1] : vector<8x16xf32> to vector<8xf32>
    %143 = vector.shape_cast %142 : vector<8xf32> to vector<8x1xf32>
    %144 = vector.broadcast %143 : vector<8x1xf32> to vector<8x16xf32>
    %145 = arith.cmpf oge, %141, %144 : vector<8x16xf32>
    %cst_55 = arith.constant 0xFF800000 : f32
    %146 = vector.broadcast %cst_55 : f32 to vector<8x16xf32>
    %147 = arith.select %145, %146, %141 : vector<8x16xi1>, vector<8x16xf32>
    %cst_56 = arith.constant dense<0xFF800000> : vector<8xf32>
    %148 = vector.multi_reduction <maximumf>, %147, %cst_56 [1] : vector<8x16xf32> to vector<8xf32>
    %149 = vector.shape_cast %148 : vector<8xf32> to vector<8x1xf32>
    %150 = vector.broadcast %149 : vector<8x1xf32> to vector<8x16xf32>
    %151 = arith.cmpf oge, %129, %150 : vector<8x16xf32>
    %152 = arith.extui %151 : vector<8x16xi1> to vector<8x16xi32>
    %153 = arith.sitofp %152 : vector<8x16xi32> to vector<8x16xf32>
    %154 = arith.mulf %129, %153 : vector<8x16xf32>
    %cst_57 = arith.constant dense<0.000000e+00> : vector<8x32xf32>
    %155 = tpu.matmul %154, %82, %cst_57 {dimension_numbers = #tpu.dot_dimension_numbers<[1], [0], [0], [1], [0, 0, 1, 1], [], []>} : vector<8x16xf32>, vector<16x32xf32>, vector<8x32xf32> -> vector<8x32xf32>
    %156 = vector.extract_strided_slice %37 {offsets = [0, 0], sizes = [32, 128], strides = [1, 1]} : vector<64x128xf32> to vector<32x128xf32>
    %cst_58 = arith.constant dense<0.000000e+00> : vector<8x128xf32>
    %157 = tpu.matmul %104, %156, %cst_58 {dimension_numbers = #tpu.dot_dimension_numbers<[1], [0], [0], [1], [0, 0, 1, 1], [], []>} : vector<8x32xf32>, vector<32x128xf32>, vector<8x128xf32> -> vector<8x128xf32>
    %158 = vector.extract_strided_slice %37 {offsets = [32, 0], sizes = [32, 128], strides = [1, 1]} : vector<64x128xf32> to vector<32x128xf32>
    %cst_59 = arith.constant dense<0.000000e+00> : vector<8x128xf32>
    %159 = tpu.matmul %155, %158, %cst_59 {dimension_numbers = #tpu.dot_dimension_numbers<[1], [0], [0], [1], [0, 0, 1, 1], [], []>} : vector<8x32xf32>, vector<32x128xf32>, vector<8x128xf32> -> vector<8x128xf32>
    %160 = arith.addf %157, %159 : vector<8x128xf32>
    %c0_60 = arith.constant 0 : index
    %c0_61 = arith.constant 0 : index
    %c0_62 = arith.constant 0 : index
    %161 = vector.load %arg8[%c0_60, %c0_61, %c0_62] : memref<2x1x128xf32, #tpu.memory_space<vmem>>, vector<1x1x128xf32>
    %162 = vector.shape_cast %161 : vector<1x1x128xf32> to vector<1x128xf32>
    %163 = vector.broadcast %162 : vector<1x128xf32> to vector<8x128xf32>
    %164 = arith.addf %160, %163 : vector<8x128xf32>
    %cst_63 = arith.constant 0.000000e+00 : f32
    %165 = vector.broadcast %cst_63 : f32 to vector<8x128xf32>
    %166 = arith.maximumf %164, %165 : vector<8x128xf32>
    %c0_64 = arith.constant 0 : index
    %c0_65 = arith.constant 0 : index
    %c0_66 = arith.constant 0 : index
    %167 = vector.load %arg9[%c0_64, %c0_65, %c0_66] : memref<2x128x32xf32, #tpu.memory_space<vmem>>, vector<1x128x32xf32>
    %168 = vector.shape_cast %167 : vector<1x128x32xf32> to vector<128x32xf32>
    %cst_67 = arith.constant dense<0.000000e+00> : vector<8x32xf32>
    %169 = tpu.matmul %166, %168, %cst_67 {dimension_numbers = #tpu.dot_dimension_numbers<[1], [0], [0], [1], [0, 0, 1, 1], [], []>} : vector<8x128xf32>, vector<128x32xf32>, vector<8x32xf32> -> vector<8x32xf32>
    %170 = vector.broadcast %31 : vector<1x32xf32> to vector<8x32xf32>
    %171 = arith.addf %169, %170 : vector<8x32xf32>
    %172 = vector.extract_strided_slice %35 {offsets = [0, 32], sizes = [32, 32], strides = [1, 1]} : vector<32x96xf32> to vector<32x32xf32>
    %cst_68 = arith.constant dense<0.000000e+00> : vector<8x32xf32>
    %173 = tpu.matmul %171, %172, %cst_68 {dimension_numbers = #tpu.dot_dimension_numbers<[1], [0], [0], [1], [0, 0, 1, 1], [], []>} : vector<8x32xf32>, vector<32x32xf32>, vector<8x32xf32> -> vector<8x32xf32>
    %174 = vector.broadcast %29 : vector<1x32xf32> to vector<8x32xf32>
    %175 = arith.addf %173, %174 : vector<8x32xf32>
    %cst_69 = arith.constant 0.000000e+00 : f32
    %176 = vector.broadcast %cst_69 : f32 to vector<8x32xf32>
    %177 = arith.maximumf %175, %176 : vector<8x32xf32>
    %cst_70 = arith.constant dense<0.000000e+00> : vector<16x8xf32>
    %178 = tpu.matmul %72, %177, %cst_70 {dimension_numbers = #tpu.dot_dimension_numbers<[1], [1], [0], [0], [0, 0, 1, 0], [], []>} : vector<16x32xf32>, vector<8x32xf32>, vector<16x8xf32> -> vector<16x8xf32>
    %cst_71 = arith.constant 0.176776692 : f32
    %179 = vector.broadcast %cst_71 : f32 to vector<16x8xf32>
    %180 = arith.mulf %178, %179 : vector<16x8xf32>
    %cst_72 = arith.constant dense<0xFF800000> : vector<16xf32>
    %181 = vector.multi_reduction <maximumf>, %180, %cst_72 [1] : vector<16x8xf32> to vector<16xf32>
    %182 = vector.shape_cast %181 : vector<16xf32> to vector<16x1xf32>
    %183 = vector.broadcast %182 : vector<16x1xf32> to vector<16x8xf32>
    %184 = arith.subf %180, %183 : vector<16x8xf32>
    %185 = math.exp %184 : vector<16x8xf32>
    %cst_73 = arith.constant dense<0.000000e+00> : vector<16xf32>
    %186 = vector.multi_reduction <add>, %185, %cst_73 [1] : vector<16x8xf32> to vector<16xf32>
    %187 = vector.shape_cast %186 : vector<16xf32> to vector<16x1xf32>
    %188 = tpu.reciprocal %187 {approx = true} : vector<16x1xf32> -> vector<16x1xf32>
    %189 = vector.broadcast %188 : vector<16x1xf32> to vector<16x8xf32>
    %190 = arith.mulf %185, %189 : vector<16x8xf32>
    %cst_74 = arith.constant dense<0xFF800000> : vector<16xf32>
    %191 = vector.multi_reduction <maximumf>, %190, %cst_74 [1] : vector<16x8xf32> to vector<16xf32>
    %192 = vector.shape_cast %191 : vector<16xf32> to vector<16x1xf32>
    %193 = vector.broadcast %192 : vector<16x1xf32> to vector<16x8xf32>
    %194 = arith.cmpf oge, %190, %193 : vector<16x8xf32>
    %cst_75 = arith.constant 0xFF800000 : f32
    %195 = vector.broadcast %cst_75 : f32 to vector<16x8xf32>
    %196 = arith.select %194, %195, %190 : vector<16x8xi1>, vector<16x8xf32>
    %cst_76 = arith.constant dense<0xFF800000> : vector<16xf32>
    %197 = vector.multi_reduction <maximumf>, %196, %cst_76 [1] : vector<16x8xf32> to vector<16xf32>
    %198 = vector.shape_cast %197 : vector<16xf32> to vector<16x1xf32>
    %199 = vector.broadcast %198 : vector<16x1xf32> to vector<16x8xf32>
    %200 = arith.cmpf oge, %190, %199 : vector<16x8xf32>
    %201 = arith.extui %200 : vector<16x8xi1> to vector<16x8xi32>
    %202 = arith.sitofp %201 : vector<16x8xi32> to vector<16x8xf32>
    %203 = arith.mulf %190, %202 : vector<16x8xf32>
    %204 = vector.extract_strided_slice %39 {offsets = [0, 0], sizes = [32, 32], strides = [1, 1]} : vector<32x64xf32> to vector<32x32xf32>
    %cst_77 = arith.constant dense<0.000000e+00> : vector<8x32xf32>
    %205 = tpu.matmul %171, %204, %cst_77 {dimension_numbers = #tpu.dot_dimension_numbers<[1], [0], [0], [1], [0, 0, 1, 1], [], []>} : vector<8x32xf32>, vector<32x32xf32>, vector<8x32xf32> -> vector<8x32xf32>
    %206 = vector.broadcast %32 : vector<1x32xf32> to vector<8x32xf32>
    %207 = arith.addf %205, %206 : vector<8x32xf32>
    %cst_78 = arith.constant dense<0.000000e+00> : vector<16x32xf32>
    %208 = tpu.matmul %203, %207, %cst_78 {dimension_numbers = #tpu.dot_dimension_numbers<[1], [0], [0], [1], [0, 0, 1, 1], [], []>} : vector<16x8xf32>, vector<8x32xf32>, vector<16x32xf32> -> vector<16x32xf32>
    %209 = arith.addf %19, %208 : vector<16x32xf32>
    %cst_79 = arith.constant 0.000000e+00 : f32
    %210 = vector.broadcast %cst_79 : f32 to vector<16x32xf32>
    %211 = arith.maximumf %209, %210 : vector<16x32xf32>
    %212 = vector.extract_strided_slice %39 {offsets = [0, 32], sizes = [32, 32], strides = [1, 1]} : vector<32x64xf32> to vector<32x32xf32>
    %cst_80 = arith.constant dense<0.000000e+00> : vector<16x32xf32>
    %213 = tpu.matmul %211, %212, %cst_80 {dimension_numbers = #tpu.dot_dimension_numbers<[1], [0], [0], [1], [0, 0, 1, 1], [], []>} : vector<16x32xf32>, vector<32x32xf32>, vector<16x32xf32> -> vector<16x32xf32>
    %214 = vector.broadcast %33 : vector<1x32xf32> to vector<16x32xf32>
    %215 = arith.addf %213, %214 : vector<16x32xf32>
    %cst_81 = arith.constant 0.000000e+00 : f32
    %216 = vector.broadcast %cst_81 : f32 to vector<16x32xf32>
    %217 = arith.maximumf %215, %216 : vector<16x32xf32>
    %c0_82 = arith.constant 0 : index
    %c0_83 = arith.constant 0 : index
    %218 = vector.load %arg13[%c0_82, %c0_83] : memref<16x64xf32, #tpu.memory_space<vmem>>, vector<16x32xf32>
    tpu.vector_store %arg13[%c0_82, %c0_83], %217 {strides = array<i32>} : memref<16x64xf32, #tpu.memory_space<vmem>>, vector<16x32xf32>,
    %c0_84 = arith.constant 0 : index
    %c4 = arith.constant 4 : index
    %219 = vector.load %arg14[%c0_84, %c4] : memref<16x36xf32, #tpu.memory_space<vmem>>, vector<16x8xf32>
    tpu.vector_store %arg14[%c0_84, %c4], %203 {strides = array<i32>} : memref<16x36xf32, #tpu.memory_space<vmem>>, vector<16x8xf32>,
    %c0_85 = arith.constant 0 : index
    %c12 = arith.constant 12 : index
    %220 = vector.load %arg14[%c0_85, %c12] : memref<16x36xf32, #tpu.memory_space<vmem>>, vector<16x8xf32>
    tpu.vector_store %arg14[%c0_85, %c12], %180 {strides = array<i32>} : memref<16x36xf32, #tpu.memory_space<vmem>>, vector<16x8xf32>,
    %c1_86 = arith.constant 1 : index
    %c0_87 = arith.constant 0 : index
    %c0_88 = arith.constant 0 : index
    %221 = vector.load %arg5[%c1_86, %c0_87, %c0_88] : memref<2x12x32xf32, #tpu.memory_space<vmem>>, vector<1x12x32xf32>
    %222 = vector.shape_cast %221 : vector<1x12x32xf32> to vector<12x32xf32>
    %223 = vector.extract_strided_slice %222 {offsets = [0, 0], sizes = [1, 32], strides = [1, 1]} : vector<12x32xf32> to vector<1x32xf32>
    %224 = vector.extract_strided_slice %222 {offsets = [1, 0], sizes = [1, 32], strides = [1, 1]} : vector<12x32xf32> to vector<1x32xf32>
    %225 = vector.extract_strided_slice %222 {offsets = [2, 0], sizes = [1, 32], strides = [1, 1]} : vector<12x32xf32> to vector<1x32xf32>
    %226 = vector.extract_strided_slice %222 {offsets = [3, 0], sizes = [1, 32], strides = [1, 1]} : vector<12x32xf32> to vector<1x32xf32>
    %227 = vector.extract_strided_slice %222 {offsets = [4, 0], sizes = [1, 32], strides = [1, 1]} : vector<12x32xf32> to vector<1x32xf32>
    %228 = vector.extract_strided_slice %222 {offsets = [5, 0], sizes = [1, 32], strides = [1, 1]} : vector<12x32xf32> to vector<1x32xf32>
    %229 = vector.extract_strided_slice %222 {offsets = [6, 0], sizes = [1, 32], strides = [1, 1]} : vector<12x32xf32> to vector<1x32xf32>
    %230 = vector.extract_strided_slice %222 {offsets = [7, 0], sizes = [1, 32], strides = [1, 1]} : vector<12x32xf32> to vector<1x32xf32>
    %231 = vector.extract_strided_slice %222 {offsets = [8, 0], sizes = [1, 32], strides = [1, 1]} : vector<12x32xf32> to vector<1x32xf32>
    %232 = vector.extract_strided_slice %222 {offsets = [9, 0], sizes = [1, 32], strides = [1, 1]} : vector<12x32xf32> to vector<1x32xf32>
    %233 = vector.extract_strided_slice %222 {offsets = [10, 0], sizes = [1, 32], strides = [1, 1]} : vector<12x32xf32> to vector<1x32xf32>
    %234 = vector.extract_strided_slice %222 {offsets = [11, 0], sizes = [1, 32], strides = [1, 1]} : vector<12x32xf32> to vector<1x32xf32>
    %c1_89 = arith.constant 1 : index
    %c0_90 = arith.constant 0 : index
    %c0_91 = arith.constant 0 : index
    %235 = vector.load %arg6[%c1_89, %c0_90, %c0_91] : memref<2x32x96xf32, #tpu.memory_space<vmem>>, vector<1x32x96xf32>
    %236 = vector.shape_cast %235 : vector<1x32x96xf32> to vector<32x96xf32>
    %c1_92 = arith.constant 1 : index
    %c0_93 = arith.constant 0 : index
    %c0_94 = arith.constant 0 : index
    %237 = vector.load %arg7[%c1_92, %c0_93, %c0_94] : memref<2x64x128xf32, #tpu.memory_space<vmem>>, vector<1x64x128xf32>
    %238 = vector.shape_cast %237 : vector<1x64x128xf32> to vector<64x128xf32>
    %c1_95 = arith.constant 1 : index
    %c0_96 = arith.constant 0 : index
    %c0_97 = arith.constant 0 : index
    %239 = vector.load %arg10[%c1_95, %c0_96, %c0_97] : memref<2x32x64xf32, #tpu.memory_space<vmem>>, vector<1x32x64xf32>
    %240 = vector.shape_cast %239 : vector<1x32x64xf32> to vector<32x64xf32>
    %241 = math.exp %224 : vector<1x32xf32>
    %c1_98 = arith.constant 1 : index
    %c0_99 = arith.constant 0 : index
    %c0_100 = arith.constant 0 : index
    %242 = vector.load %arg1[%c1_98, %c0_99, %c0_100] : memref<2x8x32xf32, #tpu.memory_space<vmem>>, vector<1x8x32xf32>
    %243 = vector.shape_cast %242 : vector<1x8x32xf32> to vector<8x32xf32>
    %244 = vector.broadcast %241 : vector<1x32xf32> to vector<8x32xf32>
    %245 = arith.mulf %244, %243 : vector<8x32xf32>
    %246 = vector.broadcast %223 : vector<1x32xf32> to vector<8x32xf32>
    %247 = arith.addf %246, %245 : vector<8x32xf32>
    %cst_101 = arith.constant dense<0.000000e+00> : vector<16xf32>
    %248 = vector.multi_reduction <add>, %217, %cst_101 [1] : vector<16x32xf32> to vector<16xf32>
    %249 = vector.shape_cast %248 : vector<16xf32> to vector<16x1xf32>
    %cst_102 = arith.constant 3.200000e+01 : f32
    %250 = vector.broadcast %cst_102 : f32 to vector<16x1xf32>
    %251 = arith.divf %249, %250 : vector<16x1xf32>
    %252 = arith.mulf %217, %217 : vector<16x32xf32>
    %cst_103 = arith.constant dense<0.000000e+00> : vector<16xf32>
    %253 = vector.multi_reduction <add>, %252, %cst_103 [1] : vector<16x32xf32> to vector<16xf32>
    %254 = vector.shape_cast %253 : vector<16xf32> to vector<16x1xf32>
    %cst_104 = arith.constant 3.200000e+01 : f32
    %255 = vector.broadcast %cst_104 : f32 to vector<16x1xf32>
    %256 = arith.divf %254, %255 : vector<16x1xf32>
    %257 = arith.mulf %251, %251 : vector<16x1xf32>
    %258 = arith.subf %256, %257 : vector<16x1xf32>
    %259 = vector.broadcast %251 : vector<16x1xf32> to vector<16x32xf32>
    %260 = arith.subf %217, %259 : vector<16x32xf32>
    %cst_105 = arith.constant 9.99999974E-6 : f32
    %261 = vector.broadcast %cst_105 : f32 to vector<16x1xf32>
    %262 = arith.addf %258, %261 : vector<16x1xf32>
    %263 = math.rsqrt %262 : vector<16x1xf32>
    %264 = vector.broadcast %263 : vector<16x1xf32> to vector<16x32xf32>
    %265 = arith.mulf %260, %264 : vector<16x32xf32>
    %266 = vector.broadcast %225 : vector<1x32xf32> to vector<16x32xf32>
    %267 = arith.mulf %265, %266 : vector<16x32xf32>
    %268 = vector.broadcast %226 : vector<1x32xf32> to vector<16x32xf32>
    %269 = arith.addf %267, %268 : vector<16x32xf32>
    %cst_106 = arith.constant dense<0.000000e+00> : vector<16x96xf32>
    %270 = tpu.matmul %269, %236, %cst_106 {dimension_numbers = #tpu.dot_dimension_numbers<[1], [0], [0], [1], [0, 0, 1, 1], [], []>} : vector<16x32xf32>, vector<32x96xf32>, vector<16x96xf32> -> vector<16x96xf32>
    %271 = vector.extract_strided_slice %270 {offsets = [0, 0], sizes = [16, 32], strides = [1, 1]} : vector<16x96xf32> to vector<16x32xf32>
    %272 = vector.broadcast %229 : vector<1x32xf32> to vector<16x32xf32>
    %273 = arith.addf %271, %272 : vector<16x32xf32>
    %274 = vector.extract_strided_slice %270 {offsets = [0, 32], sizes = [16, 32], strides = [1, 1]} : vector<16x96xf32> to vector<16x32xf32>
    %275 = vector.broadcast %230 : vector<1x32xf32> to vector<16x32xf32>
    %276 = arith.addf %274, %275 : vector<16x32xf32>
    %cst_107 = arith.constant 0.000000e+00 : f32
    %277 = vector.broadcast %cst_107 : f32 to vector<16x32xf32>
    %278 = arith.maximumf %276, %277 : vector<16x32xf32>
    %279 = vector.extract_strided_slice %270 {offsets = [0, 64], sizes = [16, 32], strides = [1, 1]} : vector<16x96xf32> to vector<16x32xf32>
    %280 = vector.broadcast %231 : vector<1x32xf32> to vector<16x32xf32>
    %281 = arith.addf %279, %280 : vector<16x32xf32>
    %cst_108 = arith.constant 0.000000e+00 : f32
    %282 = vector.broadcast %cst_108 : f32 to vector<16x32xf32>
    %283 = arith.maximumf %281, %282 : vector<16x32xf32>
    %cst_109 = arith.constant dense<0.000000e+00> : vector<8xf32>
    %284 = vector.multi_reduction <add>, %247, %cst_109 [1] : vector<8x32xf32> to vector<8xf32>
    %285 = vector.shape_cast %284 : vector<8xf32> to vector<8x1xf32>
    %cst_110 = arith.constant 3.200000e+01 : f32
    %286 = vector.broadcast %cst_110 : f32 to vector<8x1xf32>
    %287 = arith.divf %285, %286 : vector<8x1xf32>
    %288 = arith.mulf %247, %247 : vector<8x32xf32>
    %cst_111 = arith.constant dense<0.000000e+00> : vector<8xf32>
    %289 = vector.multi_reduction <add>, %288, %cst_111 [1] : vector<8x32xf32> to vector<8xf32>
    %290 = vector.shape_cast %289 : vector<8xf32> to vector<8x1xf32>
    %cst_112 = arith.constant 3.200000e+01 : f32
    %291 = vector.broadcast %cst_112 : f32 to vector<8x1xf32>
    %292 = arith.divf %290, %291 : vector<8x1xf32>
    %293 = arith.mulf %287, %287 : vector<8x1xf32>
    %294 = arith.subf %292, %293 : vector<8x1xf32>
    %295 = vector.broadcast %287 : vector<8x1xf32> to vector<8x32xf32>
    %296 = arith.subf %247, %295 : vector<8x32xf32>
    %cst_113 = arith.constant 9.99999974E-6 : f32
    %297 = vector.broadcast %cst_113 : f32 to vector<8x1xf32>
    %298 = arith.addf %294, %297 : vector<8x1xf32>
    %299 = math.rsqrt %298 : vector<8x1xf32>
    %300 = vector.broadcast %299 : vector<8x1xf32> to vector<8x32xf32>
    %301 = arith.mulf %296, %300 : vector<8x32xf32>
    %302 = vector.broadcast %227 : vector<1x32xf32> to vector<8x32xf32>
    %303 = arith.mulf %301, %302 : vector<8x32xf32>
    %304 = vector.broadcast %228 : vector<1x32xf32> to vector<8x32xf32>
    %305 = arith.addf %303, %304 : vector<8x32xf32>
    %306 = vector.extract_strided_slice %236 {offsets = [0, 0], sizes = [32, 32], strides = [1, 1]} : vector<32x96xf32> to vector<32x32xf32>
    %cst_114 = arith.constant dense<0.000000e+00> : vector<8x32xf32>
    %307 = tpu.matmul %305, %306, %cst_114 {dimension_numbers = #tpu.dot_dimension_numbers<[1], [0], [0], [1], [0, 0, 1, 1], [], []>} : vector<8x32xf32>, vector<32x32xf32>, vector<8x32xf32> -> vector<8x32xf32>
    %308 = vector.broadcast %229 : vector<1x32xf32> to vector<8x32xf32>
    %309 = arith.addf %307, %308 : vector<8x32xf32>
    %cst_115 = arith.constant 0.000000e+00 : f32
    %310 = vector.broadcast %cst_115 : f32 to vector<8x32xf32>
    %311 = arith.maximumf %309, %310 : vector<8x32xf32>
    %cst_116 = arith.constant dense<0.000000e+00> : vector<8x16xf32>
    %312 = tpu.matmul %311, %278, %cst_116 {dimension_numbers = #tpu.dot_dimension_numbers<[1], [1], [0], [0], [0, 0, 1, 0], [], []>} : vector<8x32xf32>, vector<16x32xf32>, vector<8x16xf32> -> vector<8x16xf32>
    %cst_117 = arith.constant 0.176776692 : f32
    %313 = vector.broadcast %cst_117 : f32 to vector<8x16xf32>
    %314 = arith.mulf %312, %313 : vector<8x16xf32>
    %cst_118 = arith.constant dense<0xFF800000> : vector<8xf32>
    %315 = vector.multi_reduction <maximumf>, %314, %cst_118 [1] : vector<8x16xf32> to vector<8xf32>
    %316 = vector.shape_cast %315 : vector<8xf32> to vector<8x1xf32>
    %317 = vector.broadcast %316 : vector<8x1xf32> to vector<8x16xf32>
    %318 = arith.subf %314, %317 : vector<8x16xf32>
    %319 = math.exp %318 : vector<8x16xf32>
    %cst_119 = arith.constant dense<0.000000e+00> : vector<8xf32>
    %320 = vector.multi_reduction <add>, %319, %cst_119 [1] : vector<8x16xf32> to vector<8xf32>
    %321 = vector.shape_cast %320 : vector<8xf32> to vector<8x1xf32>
    %cst_120 = arith.constant 9.99999993E-9 : f32
    %322 = vector.broadcast %cst_120 : f32 to vector<8x1xf32>
    %323 = arith.mulf %322, %321 : vector<8x1xf32>
    %324 = vector.broadcast %323 : vector<8x1xf32> to vector<8x16xf32>
    %325 = arith.addf %319, %324 : vector<8x16xf32>
    %cst_121 = arith.constant 1.00000012 : f32
    %326 = vector.broadcast %cst_121 : f32 to vector<8x1xf32>
    %327 = arith.mulf %321, %326 : vector<8x1xf32>
    %328 = tpu.reciprocal %327 {approx = true} : vector<8x1xf32> -> vector<8x1xf32>
    %329 = vector.broadcast %328 : vector<8x1xf32> to vector<8x16xf32>
    %330 = arith.mulf %325, %329 : vector<8x16xf32>
    %cst_122 = arith.constant dense<0xFF800000> : vector<8xf32>
    %331 = vector.multi_reduction <maximumf>, %330, %cst_122 [1] : vector<8x16xf32> to vector<8xf32>
    %332 = vector.shape_cast %331 : vector<8xf32> to vector<8x1xf32>
    %333 = vector.broadcast %332 : vector<8x1xf32> to vector<8x16xf32>
    %334 = arith.cmpf oge, %330, %333 : vector<8x16xf32>
    %cst_123 = arith.constant 0xFF800000 : f32
    %335 = vector.broadcast %cst_123 : f32 to vector<8x16xf32>
    %336 = arith.select %334, %335, %330 : vector<8x16xi1>, vector<8x16xf32>
    %cst_124 = arith.constant dense<0xFF800000> : vector<8xf32>
    %337 = vector.multi_reduction <maximumf>, %336, %cst_124 [1] : vector<8x16xf32> to vector<8xf32>
    %338 = vector.shape_cast %337 : vector<8xf32> to vector<8x1xf32>
    %339 = vector.broadcast %338 : vector<8x1xf32> to vector<8x16xf32>
    %340 = arith.cmpf oge, %336, %339 : vector<8x16xf32>
    %cst_125 = arith.constant 0xFF800000 : f32
    %341 = vector.broadcast %cst_125 : f32 to vector<8x16xf32>
    %342 = arith.select %340, %341, %336 : vector<8x16xi1>, vector<8x16xf32>
    %cst_126 = arith.constant dense<0xFF800000> : vector<8xf32>
    %343 = vector.multi_reduction <maximumf>, %342, %cst_126 [1] : vector<8x16xf32> to vector<8xf32>
    %344 = vector.shape_cast %343 : vector<8xf32> to vector<8x1xf32>
    %345 = vector.broadcast %344 : vector<8x1xf32> to vector<8x16xf32>
    %346 = arith.cmpf oge, %342, %345 : vector<8x16xf32>
    %cst_127 = arith.constant 0xFF800000 : f32
    %347 = vector.broadcast %cst_127 : f32 to vector<8x16xf32>
    %348 = arith.select %346, %347, %342 : vector<8x16xi1>, vector<8x16xf32>
    %cst_128 = arith.constant dense<0xFF800000> : vector<8xf32>
    %349 = vector.multi_reduction <maximumf>, %348, %cst_128 [1] : vector<8x16xf32> to vector<8xf32>
    %350 = vector.shape_cast %349 : vector<8xf32> to vector<8x1xf32>
    %351 = vector.broadcast %350 : vector<8x1xf32> to vector<8x16xf32>
    %352 = arith.cmpf oge, %330, %351 : vector<8x16xf32>
    %353 = arith.extui %352 : vector<8x16xi1> to vector<8x16xi32>
    %354 = arith.sitofp %353 : vector<8x16xi32> to vector<8x16xf32>
    %355 = arith.mulf %330, %354 : vector<8x16xf32>
    %cst_129 = arith.constant dense<0.000000e+00> : vector<8x32xf32>
    %356 = tpu.matmul %355, %283, %cst_129 {dimension_numbers = #tpu.dot_dimension_numbers<[1], [0], [0], [1], [0, 0, 1, 1], [], []>} : vector<8x16xf32>, vector<16x32xf32>, vector<8x32xf32> -> vector<8x32xf32>
    %357 = vector.extract_strided_slice %238 {offsets = [0, 0], sizes = [32, 128], strides = [1, 1]} : vector<64x128xf32> to vector<32x128xf32>
    %cst_130 = arith.constant dense<0.000000e+00> : vector<8x128xf32>
    %358 = tpu.matmul %305, %357, %cst_130 {dimension_numbers = #tpu.dot_dimension_numbers<[1], [0], [0], [1], [0, 0, 1, 1], [], []>} : vector<8x32xf32>, vector<32x128xf32>, vector<8x128xf32> -> vector<8x128xf32>
    %359 = vector.extract_strided_slice %238 {offsets = [32, 0], sizes = [32, 128], strides = [1, 1]} : vector<64x128xf32> to vector<32x128xf32>
    %cst_131 = arith.constant dense<0.000000e+00> : vector<8x128xf32>
    %360 = tpu.matmul %356, %359, %cst_131 {dimension_numbers = #tpu.dot_dimension_numbers<[1], [0], [0], [1], [0, 0, 1, 1], [], []>} : vector<8x32xf32>, vector<32x128xf32>, vector<8x128xf32> -> vector<8x128xf32>
    %361 = arith.addf %358, %360 : vector<8x128xf32>
    %c1_132 = arith.constant 1 : index
    %c0_133 = arith.constant 0 : index
    %c0_134 = arith.constant 0 : index
    %362 = vector.load %arg8[%c1_132, %c0_133, %c0_134] : memref<2x1x128xf32, #tpu.memory_space<vmem>>, vector<1x1x128xf32>
    %363 = vector.shape_cast %362 : vector<1x1x128xf32> to vector<1x128xf32>
    %364 = vector.broadcast %363 : vector<1x128xf32> to vector<8x128xf32>
    %365 = arith.addf %361, %364 : vector<8x128xf32>
    %cst_135 = arith.constant 0.000000e+00 : f32
    %366 = vector.broadcast %cst_135 : f32 to vector<8x128xf32>
    %367 = arith.maximumf %365, %366 : vector<8x128xf32>
    %c1_136 = arith.constant 1 : index
    %c0_137 = arith.constant 0 : index
    %c0_138 = arith.constant 0 : index
    %368 = vector.load %arg9[%c1_136, %c0_137, %c0_138] : memref<2x128x32xf32, #tpu.memory_space<vmem>>, vector<1x128x32xf32>
    %369 = vector.shape_cast %368 : vector<1x128x32xf32> to vector<128x32xf32>
    %cst_139 = arith.constant dense<0.000000e+00> : vector<8x32xf32>
    %370 = tpu.matmul %367, %369, %cst_139 {dimension_numbers = #tpu.dot_dimension_numbers<[1], [0], [0], [1], [0, 0, 1, 1], [], []>} : vector<8x128xf32>, vector<128x32xf32>, vector<8x32xf32> -> vector<8x32xf32>
    %371 = vector.broadcast %232 : vector<1x32xf32> to vector<8x32xf32>
    %372 = arith.addf %370, %371 : vector<8x32xf32>
    %373 = vector.extract_strided_slice %236 {offsets = [0, 32], sizes = [32, 32], strides = [1, 1]} : vector<32x96xf32> to vector<32x32xf32>
    %cst_140 = arith.constant dense<0.000000e+00> : vector<8x32xf32>
    %374 = tpu.matmul %372, %373, %cst_140 {dimension_numbers = #tpu.dot_dimension_numbers<[1], [0], [0], [1], [0, 0, 1, 1], [], []>} : vector<8x32xf32>, vector<32x32xf32>, vector<8x32xf32> -> vector<8x32xf32>
    %375 = vector.broadcast %230 : vector<1x32xf32> to vector<8x32xf32>
    %376 = arith.addf %374, %375 : vector<8x32xf32>
    %cst_141 = arith.constant 0.000000e+00 : f32
    %377 = vector.broadcast %cst_141 : f32 to vector<8x32xf32>
    %378 = arith.maximumf %376, %377 : vector<8x32xf32>
    %cst_142 = arith.constant dense<0.000000e+00> : vector<16x8xf32>
    %379 = tpu.matmul %273, %378, %cst_142 {dimension_numbers = #tpu.dot_dimension_numbers<[1], [1], [0], [0], [0, 0, 1, 0], [], []>} : vector<16x32xf32>, vector<8x32xf32>, vector<16x8xf32> -> vector<16x8xf32>
    %cst_143 = arith.constant 0.176776692 : f32
    %380 = vector.broadcast %cst_143 : f32 to vector<16x8xf32>
    %381 = arith.mulf %379, %380 : vector<16x8xf32>
    %cst_144 = arith.constant dense<0xFF800000> : vector<16xf32>
    %382 = vector.multi_reduction <maximumf>, %381, %cst_144 [1] : vector<16x8xf32> to vector<16xf32>
    %383 = vector.shape_cast %382 : vector<16xf32> to vector<16x1xf32>
    %384 = vector.broadcast %383 : vector<16x1xf32> to vector<16x8xf32>
    %385 = arith.subf %381, %384 : vector<16x8xf32>
    %386 = math.exp %385 : vector<16x8xf32>
    %cst_145 = arith.constant dense<0.000000e+00> : vector<16xf32>
    %387 = vector.multi_reduction <add>, %386, %cst_145 [1] : vector<16x8xf32> to vector<16xf32>
    %388 = vector.shape_cast %387 : vector<16xf32> to vector<16x1xf32>
    %389 = tpu.reciprocal %388 {approx = true} : vector<16x1xf32> -> vector<16x1xf32>
    %390 = vector.broadcast %389 : vector<16x1xf32> to vector<16x8xf32>
    %391 = arith.mulf %386, %390 : vector<16x8xf32>
    %cst_146 = arith.constant dense<0xFF800000> : vector<16xf32>
    %392 = vector.multi_reduction <maximumf>, %391, %cst_146 [1] : vector<16x8xf32> to vector<16xf32>
    %393 = vector.shape_cast %392 : vector<16xf32> to vector<16x1xf32>
    %394 = vector.broadcast %393 : vector<16x1xf32> to vector<16x8xf32>
    %395 = arith.cmpf oge, %391, %394 : vector<16x8xf32>
    %cst_147 = arith.constant 0xFF800000 : f32
    %396 = vector.broadcast %cst_147 : f32 to vector<16x8xf32>
    %397 = arith.select %395, %396, %391 : vector<16x8xi1>, vector<16x8xf32>
    %cst_148 = arith.constant dense<0xFF800000> : vector<16xf32>
    %398 = vector.multi_reduction <maximumf>, %397, %cst_148 [1] : vector<16x8xf32> to vector<16xf32>
    %399 = vector.shape_cast %398 : vector<16xf32> to vector<16x1xf32>
    %400 = vector.broadcast %399 : vector<16x1xf32> to vector<16x8xf32>
    %401 = arith.cmpf oge, %391, %400 : vector<16x8xf32>
    %402 = arith.extui %401 : vector<16x8xi1> to vector<16x8xi32>
    %403 = arith.sitofp %402 : vector<16x8xi32> to vector<16x8xf32>
    %404 = arith.mulf %391, %403 : vector<16x8xf32>
    %405 = vector.extract_strided_slice %240 {offsets = [0, 0], sizes = [32, 32], strides = [1, 1]} : vector<32x64xf32> to vector<32x32xf32>
    %cst_149 = arith.constant dense<0.000000e+00> : vector<8x32xf32>
    %406 = tpu.matmul %372, %405, %cst_149 {dimension_numbers = #tpu.dot_dimension_numbers<[1], [0], [0], [1], [0, 0, 1, 1], [], []>} : vector<8x32xf32>, vector<32x32xf32>, vector<8x32xf32> -> vector<8x32xf32>
    %407 = vector.broadcast %233 : vector<1x32xf32> to vector<8x32xf32>
    %408 = arith.addf %406, %407 : vector<8x32xf32>
    %cst_150 = arith.constant dense<0.000000e+00> : vector<16x32xf32>
    %409 = tpu.matmul %404, %408, %cst_150 {dimension_numbers = #tpu.dot_dimension_numbers<[1], [0], [0], [1], [0, 0, 1, 1], [], []>} : vector<16x8xf32>, vector<8x32xf32>, vector<16x32xf32> -> vector<16x32xf32>
    %410 = arith.addf %217, %409 : vector<16x32xf32>
    %cst_151 = arith.constant 0.000000e+00 : f32
    %411 = vector.broadcast %cst_151 : f32 to vector<16x32xf32>
    %412 = arith.maximumf %410, %411 : vector<16x32xf32>
    %413 = vector.extract_strided_slice %240 {offsets = [0, 32], sizes = [32, 32], strides = [1, 1]} : vector<32x64xf32> to vector<32x32xf32>
    %cst_152 = arith.constant dense<0.000000e+00> : vector<16x32xf32>
    %414 = tpu.matmul %412, %413, %cst_152 {dimension_numbers = #tpu.dot_dimension_numbers<[1], [0], [0], [1], [0, 0, 1, 1], [], []>} : vector<16x32xf32>, vector<32x32xf32>, vector<16x32xf32> -> vector<16x32xf32>
    %415 = vector.broadcast %234 : vector<1x32xf32> to vector<16x32xf32>
    %416 = arith.addf %414, %415 : vector<16x32xf32>
    %cst_153 = arith.constant 0.000000e+00 : f32
    %417 = vector.broadcast %cst_153 : f32 to vector<16x32xf32>
    %418 = arith.maximumf %416, %417 : vector<16x32xf32>
    %c0_154 = arith.constant 0 : index
    %c32_155 = arith.constant 32 : index
    %419 = vector.load %arg13[%c0_154, %c32_155] : memref<16x64xf32, #tpu.memory_space<vmem>>, vector<16x32xf32>
    tpu.vector_store %arg13[%c0_154, %c32_155], %418 {strides = array<i32>} : memref<16x64xf32, #tpu.memory_space<vmem>>, vector<16x32xf32>,
    %c0_156 = arith.constant 0 : index
    %c20 = arith.constant 20 : index
    %420 = vector.load %arg14[%c0_156, %c20] : memref<16x36xf32, #tpu.memory_space<vmem>>, vector<16x8xf32>
    tpu.vector_store %arg14[%c0_156, %c20], %404 {strides = array<i32>} : memref<16x36xf32, #tpu.memory_space<vmem>>, vector<16x8xf32>,
    %c0_157 = arith.constant 0 : index
    %c28 = arith.constant 28 : index
    %421 = vector.load %arg14[%c0_157, %c28] : memref<16x36xf32, #tpu.memory_space<vmem>>, vector<16x8xf32>
    tpu.vector_store %arg14[%c0_157, %c28], %381 {strides = array<i32>} : memref<16x36xf32, #tpu.memory_space<vmem>>, vector<16x8xf32>,
    %c0_158 = arith.constant 0 : index
    %c0_159 = arith.constant 0 : index
    %422 = vector.load %arg13[%c0_158, %c0_159] : memref<16x64xf32, #tpu.memory_space<vmem>>, vector<16x64xf32>
    %c0_160 = arith.constant 0 : index
    %c0_161 = arith.constant 0 : index
    %423 = vector.load %arg11[%c0_160, %c0_161] : memref<64x4xf32, #tpu.memory_space<vmem>>, vector<64x4xf32>
    %cst_162 = arith.constant dense<0.000000e+00> : vector<16x4xf32>
    %424 = tpu.matmul %422, %423, %cst_162 {dimension_numbers = #tpu.dot_dimension_numbers<[1], [0], [0], [1], [0, 0, 1, 1], [], []>} : vector<16x64xf32>, vector<64x4xf32>, vector<16x4xf32> -> vector<16x4xf32>
    %c0_163 = arith.constant 0 : index
    %c0_164 = arith.constant 0 : index
    %425 = vector.load %arg12[%c0_163, %c0_164] : memref<1x4xf32, #tpu.memory_space<vmem>>, vector<1x4xf32>
    %426 = vector.broadcast %425 : vector<1x4xf32> to vector<16x4xf32>
    %427 = arith.addf %424, %426 : vector<16x4xf32>
    %c0_165 = arith.constant 0 : index
    %c0_166 = arith.constant 0 : index
    %428 = vector.load %arg14[%c0_165, %c0_166] : memref<16x36xf32, #tpu.memory_space<vmem>>, vector<16x4xf32>
    tpu.vector_store %arg14[%c0_165, %c0_166], %427 {strides = array<i32>} : memref<16x36xf32, #tpu.memory_space<vmem>>, vector<16x4xf32>,
    return
  }
}

</mosaic_0001>

<bundles_post_ra>
// kernel: hgnn_classifier_forward.1
= control target key start
LH: loop header
LB: loop body
LE: loop exit
PB: predicated region body
PF: predicated region fallthrough
CT: control target
= control target key end

     0   :  { %vm56_vm0 = vcmask 130048   ;;  %s4688_s0 = inlined_call_operand.vmem [shape: f32[16,16], index: 0, kind: input, shape index: {}]   ;;  %s4689_s1 = inlined_call_operand.vmem [shape: f32[2,8,32], index: 1, kind: input, shape index: {}]   ;;  %s4690_s2 = inlined_call_operand.vmem [shape: f32[16,32], index: 2, kind: input, shape index: {}]   ;;  %s4691_s3 = inlined_call_operand.vmem [shape: f32[32,64], index: 3, kind: input, shape index: {}]   ;;  %s4692_s4 = inlined_call_operand.vmem [shape: f32[3,32], index: 4, kind: input, shape index: {}]   ;;  %s4693_s5 = inlined_call_operand.vmem [shape: f32[2,12,32], index: 5, kind: input, shape index: {}]   ;;  %s4694_s6 = inlined_call_operand.vmem [shape: f32[2,32,96], index: 6, kind: input, shape index: {}]   ;;  %s4695_s7 = inlined_call_operand.vmem [shape: f32[2,64,128], index: 7, kind: input, shape index: {}]   ;;  %s4696_s8 = inlined_call_operand.vmem [shape: f32[2,1,128], index: 8, kind: input, shape index: {}]   ;;  %s4697_s9 = inlined_call_operand.vmem [shape: f32[2,128,32], index: 9, kind: input, shape index: {}]   ;;  %s4698_s10 = inlined_call_operand.vmem [shape: f32[2,32,64], index: 10, kind: input, shape index: {}]   ;;  %s4699_s11 = inlined_call_operand.vmem [shape: f32[64,4], index: 11, kind: input, shape index: {}]   ;;  %s4700_s12 = inlined_call_operand.vmem [shape: f32[1,4], index: 12, kind: input, shape index: {}]   ;;  %s4701_s13 = inlined_call_operand.hbm [shape: f32[16,64], index: 13, kind: output, shape index: {0}]   ;;  %s4702_s14 = inlined_call_operand.vmem [shape: f32[16,36], index: 14, kind: output, shape index: {1}]  }
   0x1   :  { %v49_v0 = vld [vmem:[%s4690_s2] sm:$0xff]  ;;  %v50_v1 = vld [vmem:[%s4690_s2 + $0x8] sm:$0xff] }
   0x2   :  { %v47_v2 = vld [vmem:[%s4688_s0] sm:$0xff]  ;;  %v3509_v3 = vpack.c.bf16 %v50_v1, %v49_v0  ;;  %v141_v5 = vld [vmem:[%s4691_s3 + $0x8] sm:$0xff] }
   0x3   :  { %3193 = vmatprep.mubr.msk.f32.mxu0 %vm56_vm0, %v47_v2  ;;  %v140_v4 = vld [vmem:[%s4691_s3] sm:$0xff] }
   0x4   :  { %v3513_v6 = vpack.c.bf16 %v141_v5, %v140_v4 }
   0x5   :  { %20 = vsyncpa [#allocation3], 0  ;;  %3510 = vmatprep.subr.bf16.mxu0 %v3509_v3  ;;  %v48_v7 = vld [vmem:[%s4688_s0 + $0x8] sm:$0xff]  ;;  %v142_v8 = vld [vmem:[%s4691_s3 + $0x10] sm:$0xff]  ;;  %v3712_v11 = vpack.i.bf16 %v141_v5, %v140_v4  ;;  %s3846_s28 = smov 96   ;;  %vm149_vm1 = vcmask 261120   ;;  %v356_v37 = vlaneseq }
   0x6   :  { %3512 = vmatpush3.bf16.msra.mxu0 %v3509_v3  ;;  %v143_v9 = vld [vmem:[%s4691_s3 + $0x18] sm:$0xff]  ;;  %v2939_v16 = vld [vmem:[%s4692_s4] ss:$0 sm:$0xff]  ;;  %v2942_v28 = vld [vmem:[%s4692_s4 + $0x1] ss:$0 sm:$0xff]  ;;  %v3847_v4 = vmov 0.0|0.0  }
   0x7   :  { %3514 = vmatprep.subr.bf16.mxu0 %v3513_v6  ;;  %v3517_v10 = vpack.c.bf16 %v143_v9, %v142_v8  ;;  %3713 = vrot.lane.b32.xlu0 %v3712_v11, %s3846_s28  ;;  %v3717_v12 = vpack.i.bf16 %v143_v9, %v142_v8  ;;  %v3975_v35 = vld [vmem:[%s4693_s5] sm:$0xff]  ;;  %v3978_v38 = vshrl.u32 %v356_v37, 7  ;;  %v4024_v62 = vld [vmem:[%s4694_s6 + $0x8] sm:$0xff]  ;;  %v4031_v0 = vld [vmem:[%s4694_s6 + $0x10] sm:$0xff]  ;;  %vm3848_vm2 = vmmov 0   ;;  %s3850_s27 = smov 32  }
   0x8   :  { %v353_v36 = vmul.f32 1.442695, %v3975_v35  ;;  %v2945_v41 = vld [vmem:[%s4692_s4 + $0x2] ss:$0 sm:$0xff]  ;;  %v4036_v1 = vld [vmem:[%s4694_s6 + $0x18] sm:$0xff]  ;;  %v3849_v5 = vmov 0.0   ;;  %vm4101_vm3 = vmpackc.low %vm149_vm1, %vm149_vm1 }
   0x9   :  { %3194 = vmatmul.mubr.msk.f32.vlgmr.msra.gmra.mrb[0].mxu0 %vm56_vm0, %v48_v7  ;;  %v3981_v39 = vsub.s32 1, %v3978_v38  ;;  %v3990_v46 = vsub.s32 0, %v3978_v38  ;;  %v355_v48 = vld [vmem:[%s4689_s1] sm:$0xff]  ;;  %v3533_v2 = vpack.c.bf16 %v4036_v1, %v4031_v0  ;;  %v498_v3 = vsub.s32 7, %v3978_v38  ;;  %s3851_s4 = smov 64   ;;  %s3852_s19 = smov 4  }
   0xa   :  { %3516 = vmatpush3.bf16.msra.mxu0 %v3513_v6  ;;  %3782 = vpow2.f32 %v353_v36  ;;  %v4019_v61 = vld [vmem:[%s4694_s6] sm:$0xff]  ;;  %vm1238_vm8 = vcmask 64512   ;;  %s3856_s3 = smov [#allocation2]  }
   0xb   :  { %3518 = vmatprep.subr.bf16.mxu0 %v3517_v10  ;;  %3718 = vrot.lane.b32.xlu0 %v3717_v12, %s3846_s28  ;;  %v364_v52 = vrot.slane %v3975_v35, %v3990_v46  ;;  %v3529_v63 = vpack.c.bf16 %v4024_v62, %v4019_v61  ;;  %v4047_v6 = vrot.slane %v3975_v35, %v498_v3 }
   0xd   :  { %3530 = vmatprep.subr.bf16.mxu1 %v3529_v63 }
   0xe   :  { %3520 = vmatpush3.bf16.msra.mxu0 %v3517_v10  ;;  %3532 = vmatpush3.bf16.msra.mxu1 %v3529_v63 }
   0xf   :  { %3534 = vmatprep.subr.bf16.mxu1 %v3533_v2 }
  0x12   :  { %3536 = vmatpush3.bf16.msra.mxu1 %v3533_v2 }
  0x13   :  { %3543 = vmatprep.subr.bf16.mxu1 %v3847_v4 }
  0x14   :  { %v3783_v40 = vpop.eup %3782 }
  0x15   :  { %v359_v45 = vrot.slane %v3783_v40, %v3981_v39 }
  0x17   :  { %v360_v51 = vmul.f32 %v359_v45, %v355_v48  ;;  %v537_v45 = vsub.s32 4, %v3978_v38 }
  0x19   :  { %v4008_v56 = vadd.f32 %v364_v52, %v360_v51  ;;  %v538_v51 = vrot.slane %v3975_v35, %v537_v45 }
  0x1b   :  { %v520_v58 = vsel %vm149_vm1, %v4008_v56, 0.0  ;;  %v524_v59 = vmul.f32 %v4008_v56, %v4008_v56 }
  0x1d   :  { %v525_v60 = vsel %vm149_vm1, %v524_v59, 0.0 }
  0x79   :  { %v3714_v13 = vpop.permute.xlu0 %3713 }
  0x7a   :  { %v3716_v14 = vunpack.i.h.bf16 %v3714_v13  ;;  %v3715_v15 = vunpack.i.l.bf16 %v3714_v13 }
  0x7c   :  { %v3521_v17 = vpack.c.bf16 %v3716_v14, %v3715_v15 }
  0x7d   :  { %v3719_v18 = vpop.permute.xlu0 %3718 }
  0x7e   :  { %3522 = vmatprep.subr.bf16.mxu0 %v3521_v17  ;;  %v3721_v22 = vunpack.i.h.bf16 %v3719_v18  ;;  %v3720_v23 = vunpack.i.l.bf16 %v3719_v18 }
  0x80   :  { %v3525_v27 = vpack.c.bf16 %v3721_v22, %v3720_v23 }
  0xdc   :  { %v3195_v19 = vpop.f32.mrb[0].mxu0 }
  0xdd   :  { %v135_v20 = vadd.f32 %v3195_v19, %v2939_v16  ;;  %v129_v21 = vpop.f32.mrb[1].mxu0 }
  0xde   :  { %v130_v24 = vadd.f32 %v2939_v16, %v129_v21 }
  0xdf   :  { %v139_v26 = vmax.f32 %v135_v20, 0.0 }
  0xe0   :  { %v138_v25 = vmax.f32 %v130_v24, 0.0 }
  0xe2   :  { %3204 = vmatprep.mubr.msk.f32.mxu0 %vm149_vm1, %v138_v25 }
  0xe3   :  { %3205 = vmatmul.mubr.msk.f32.vlgmr.msra.gmra.mrb[2].mxu0 %vm149_vm1, %v139_v26  ;;  %v4055_v26 = vsub.s32 2, %v3978_v38 }
  0xe4   :  { %3524 = vmatpush3.bf16.msra.mxu0 %v3521_v17 }
  0xe5   :  { %3526 = vmatprep.subr.bf16.mxu0 %v3525_v27 }
  0xe8   :  { %3528 = vmatpush3.bf16.msra.mxu0 %v3525_v27 }
  0xe9   :  { %3537 = vmatprep.subr.bf16.mxu0 %v3847_v4 }
 0x1b6   :  { %v3206_v29 = vpop.f32.mrb[2].mxu0 }
 0x1b7   :  { %v228_v30 = vadd.f32 %v3206_v29, %v2942_v28  ;;  %v222_v31 = vpop.f32.mrb[3].mxu0 }
 0x1b8   :  { %v223_v32 = vadd.f32 %v2942_v28, %v222_v31  ;;  %v4058_v28 = vsub.s32 3, %v3978_v38  ;;  %v400_v31 = vrot.slane %v3975_v35, %v4055_v26 }
 0x1b9   :  { %v232_v34 = vmax.f32 %v228_v30, 0.0 }
 0x1ba   :  { %v231_v33 = vmax.f32 %v223_v32, 0.0  ;;  %v406_v36 = vrot.slane %v3975_v35, %v4058_v28 }
 0x1bc   :  { %3215 = vmatprep.mubr.msk.f32.mxu0 %vm149_vm1, %v231_v33 }
 0x1bd   :  { %3216 = vmatmul.mubr.msk.f32.vlgmr.msra.gmra.mrb[4].mxu0 %vm149_vm1, %v232_v34 }
 0x1be   :  { %3237 = vmatprep.mubr.msk.f32.mxu0 %vm3848_vm2, %v3849_v5  ;;  %3539 = vmatpush3.bf16.msra.mxu0 %v3529_v63 }
 0x1bf   :  { %3540 = vmatprep.subr.bf16.mxu0 %v3847_v4 }
 0x1c2   :  { %3542 = vmatpush3.bf16.msra.mxu0 %v3533_v2 }
 0x1c3   :  { %3547 = vmatprep.subr.bf16.mxu0 %v3847_v4 }
 0x290   :  { %v3217_v42 = vpop.f32.mrb[4].mxu0 }
 0x291   :  { %v3986_v43 = vadd.f32 %v3217_v42, %v2945_v41  ;;  %v326_v44 = vpop.f32.mrb[5].mxu0 }
 0x292   :  { %v3992_v47 = vadd.f32 %v2945_v41, %v326_v44 }
 0x293   :  { %v369_v49 = vsel %vm149_vm1, %v3986_v43, 0.0  ;;  %v376_v55 = vmul.f32 %v3986_v43, %v3986_v43 }
 0x294   :  { %370 = vadd.xlane.f32.xlu1 %v369_v49  ;;  %v375_v50 = vmul.f32 %v3992_v47, %v3992_v47  ;;  %v366_v54 = vsel %vm149_vm1, %v3992_v47, 0.0 }
 0x295   :  { %v380_v57 = vsel %vm149_vm1, %v376_v55, 0.0 }
 0x296   :  { %v377_v53 = vsel %vm149_vm1, %v375_v50, 0.0  ;;  %v542_v50 = vsub.s32 5, %v3978_v38 }
 0x297   :  { %378 = vadd.xlane.f32.xlu0 %v377_v53 }
 0x298   :  { %367 = vadd.xlane.f32.xlu1 %v366_v54  ;;  %v543_v54 = vrot.slane %v3975_v35, %v542_v50 }
 0x29c   :  { %381 = vadd.xlane.f32.xlu1 %v380_v57 }
 0x2a0   :  { %521 = vadd.xlane.f32.xlu1 %v520_v58 }
 0x2a4   :  { %526 = vadd.xlane.f32.xlu1 %v525_v60 }
 0x2b5   :  { %501 = vrot.lane.b32.xlu1 %v4047_v6, %s3850_s27 }
 0x321   :  { %v371_v7 = vpop.xlane.xlu1 %370 }
 0x322   :  { %v374_v10 = vmul.f32 0.03125, %v371_v7 }
 0x324   :  { %v379_v8 = vpop.xlane.xlu0 %378  ;;  %v386_v15 = vmul.f32 %v374_v10, %v374_v10  ;;  %v390_v33 = vsub.f32 %v3986_v43, %v374_v10 }
 0x325   :  { %v368_v9 = vpop.xlane.xlu1 %367  ;;  %v383_v12 = vmul.f32 0.03125, %v379_v8 }
 0x326   :  { %v373_v11 = vmul.f32 0.03125, %v368_v9 }
 0x328   :  { %v385_v13 = vmul.f32 %v373_v11, %v373_v11  ;;  %v389_v30 = vsub.f32 %v3992_v47, %v373_v11 }
 0x329   :  { %v382_v14 = vpop.xlane.xlu1 %381 }
 0x32a   :  { %v387_v16 = vsub.f32 %v383_v12, %v385_v13  ;;  %v384_v17 = vmul.f32 0.03125, %v382_v14 }
 0x32c   :  { %v391_v18 = vadd.f32 1e-05, %v387_v16  ;;  %v388_v19 = vsub.f32 %v384_v17, %v386_v15  ;;  %v2979_v17 = vld [vmem:[%s4695_s7 + $0x58] sm:$0xff] }
 0x32d   :  { %v522_v20 = vpop.xlane.xlu1 %521 }
 0x32e   :  { %3784 = vrsqrt.f32 %v391_v18  ;;  %v392_v21 = vadd.f32 1e-05, %v388_v19  ;;  %v523_v22 = vmul.f32 0.03125, %v522_v20  ;;  %v341_v20 = vld [vmem:[%s4695_s7] sm:$0xff] }
 0x330   :  { %3786 = vrsqrt.f32 %v392_v21  ;;  %v529_v23 = vmul.f32 %v523_v22, %v523_v22  ;;  %v531_v49 = vsub.f32 %v4008_v56, %v523_v22  ;;  %v492_v56 = vsub.s32 6, %v3978_v38  ;;  %v342_v21 = vld [vmem:[%s4695_s7 + $0x8] sm:$0xff] }
 0x331   :  { %v527_v24 = vpop.xlane.xlu1 %526  ;;  %v3557_v22 = vpack.c.bf16 %v342_v21, %v341_v20 }
 0x332   :  { %v528_v25 = vmul.f32 0.03125, %v527_v24  ;;  %v493_v58 = vrot.slane %v3975_v35, %v492_v56  ;;  %v343_v24 = vld [vmem:[%s4695_s7 + $0x10] sm:$0xff] }
 0x334   :  { %v530_v27 = vsub.f32 %v528_v25, %v529_v23  ;;  %v344_v25 = vld [vmem:[%s4695_s7 + $0x18] sm:$0xff] }
 0x335   :  { %v502_v59 = vpop.permute.xlu1 %501 }
 0x336   :  { %v532_v29 = vadd.f32 1e-05, %v530_v27  ;;  %v3560_v27 = vpack.c.bf16 %v344_v25, %v343_v24  ;;  %v345_v25 = vld [vmem:[%s4695_s7 + $0x20] sm:$0xff] }
 0x338   :  { %v3785_v32 = vpop.eup %3784  ;;  %3788 = vrsqrt.f32 %v532_v29 }
 0x339   :  { %v395_v34 = vmul.f32 %v3785_v32, %v389_v30 }
 0x33a   :  { %v3787_v37 = vpop.eup %3786 }
 0x33b   :  { %v396_v40 = vmul.f32 %v3787_v37, %v390_v33  ;;  %v401_v41 = vmul.f32 %v400_v31, %v395_v34 }
 0x33d   :  { %v402_v42 = vmul.f32 %v400_v31, %v396_v40  ;;  %v407_v44 = vadd.f32 %v406_v36, %v401_v41 }
 0x33f   :  { %v408_v48 = vadd.f32 %v406_v36, %v402_v42  ;;  %3226 = vmatprep.mubr.msk.f32.mxu1 %vm149_vm1, %v407_v44 }
 0x341   :  { %3227 = vmatmul.mubr.msk.f32.vlgmr.msra.gmra.mrb[0].mxu1 %vm149_vm1, %v408_v48 }
 0x342   :  { %v3789_v52 = vpop.eup %3788  ;;  %3244 = vmatprep.mubr.msk.f32.mxu1 %vm3848_vm2, %v3849_v5 }
 0x343   :  { %v534_v53 = vmul.f32 %v3789_v52, %v531_v49 }
 0x345   :  { %v539_v55 = vmul.f32 %v538_v51, %v534_v53 }
 0x347   :  { %v544_v57 = vadd.f32 %v543_v54, %v539_v55 }
 0x349   :  { %3238 = vmatmul.mubr.msk.f32.vlgmr.msra.gmra.mrb[6].mxu0 %vm149_vm1, %v544_v57 }
 0x34a   :  { %3251 = vmatprep.mubr.msk.f32.mxu0 %vm3848_vm2, %v3849_v5 }
 0x414   :  { %v4086_v60 = vpop.f32.mrb[0].mxu1 }
 0x415   :  { %v4089_v63 = vadd.f32 %v4086_v60, %v493_v58  ;;  %v505_v2 = vadd.f32 %v4086_v60, %v502_v59  ;;  %v4092_v7 = vpop.f32.mrb[1].mxu1 }
 0x416   :  { %v4095_v8 = vadd.f32 %v493_v58, %v4092_v7  ;;  %v504_v9 = vadd.f32 %v502_v59, %v4092_v7 }
 0x417   :  { %v507_v10 = vmax.f32 %v505_v2, 0.0 }
 0x418   :  { %v506_v11 = vmax.f32 %v504_v9, 0.0 }
 0x41a   :  { %v3722_v12 = vpack.i.bf16 %v507_v10, %v506_v11  ;;  %v4138_v10 = vld [vmem:[%s4693_s5 + $0x8] sm:$0xf] }
 0x41b   :  { %v511_v11 = vrot.slane %v4138_v10, %v3990_v46 }
 0x41c   :  { %3723 = vrot.lane.b32.xlu1 %v3722_v12, %s3846_s28  ;;  %v614_v35 = vpop.f32.mrb[6].mxu0 }
 0x41d   :  { %v3239_v13 = vpop.f32.mrb[7].mxu0  ;;  %v615_v19 = vadd.f32 %v614_v35, %v493_v58 }
 0x41f   :  { %v618_v23 = vmax.f32 %v615_v19, 0.0 }
 0x48e   :  { %v3724_v14 = vpop.permute.xlu1 %3723 }
 0x48f   :  { %v3726_v15 = vunpack.i.h.bf16 %v3724_v14  ;;  %v3725_v16 = vunpack.i.l.bf16 %v3724_v14 }
 0x491   :  { %v3544_v18 = vpack.c.bf16 %v3726_v15, %v3725_v16 }
 0x493   :  { %3546 = vmatpush3.bf16.xpose.msk.msra.mxu1 %vm4101_vm3, %v3544_v18 }
 0x494   :  { %3556 = vmatprep.subr.bf16.mxu1 %v3847_v4 }
 0x49a   :  { %3245 = vmatmul.mubr.msk.f32.vlgmr.msra.gmra.mrb[2].mxu1 %vm149_vm1, %v618_v23 }
 0x49b   :  { %3558 = vmatpush3.bf16.msra.mxu1 %v3557_v22  ;;  %3273 = vmatprep.mubr.msk.f32.mxu1 %vm3848_vm2, %v3849_v5 }
 0x49c   :  { %3559 = vmatprep.subr.bf16.mxu1 %v3847_v4 }
 0x49f   :  { %3561 = vmatpush3.bf16.msra.mxu1 %v3560_v27 }
 0x4a0   :  { %3586 = vmatprep.subr.bf16.mxu1 %v3847_v4 }
 0x4a2   :  { %3274 = vmatmul.mubr.msk.f32.vlgmr.msra.gmra.mrb[4].mxu1 %vm149_vm1, %v544_v57 }
 0x4a3   :  { %3319 = vmatprep.mubr.msk.f32.mxu1 %vm3848_vm2, %v3849_v5 }
 0x56d   :  { %v698_v29 = vpop.f32.mrb[2].mxu1 }
 0x56e   :  { %v702_v30 = vmul.f32 0.17677669, %v698_v29  ;;  %v3246_v31 = vpop.f32.mrb[3].mxu1 }
 0x56f   :  { %v347_v31 = vld [vmem:[%s4695_s7 + $0x30] sm:$0xff] }
 0x570   :  { %v703_v32 = vsel %vm56_vm0, %v702_v30, -inf }
 0x571   :  { %704 = vmax.xlane.f32.xlu0 %v703_v32  ;;  %v348_v32 = vld [vmem:[%s4695_s7 + $0x38] sm:$0xff] }
 0x575   :  { %v4129_v33 = vpop.f32.mrb[4].mxu1 }
 0x576   :  { %v3275_v34 = vpop.f32.mrb[5].mxu1 }
 0x577   :  { %v3554_v34 = vpack.c.bf16 %v348_v32, %v347_v31  ;;  %v991_v31 = vrot.slane %v4138_v10, %v3981_v39 }
 0x5fe   :  { %v705_v36 = vpop.xlane.xlu0 %704 }
 0x5ff   :  { %v706_v37 = vsub.f32 %v702_v30, %v705_v36  ;;  %v972_v36 = vld [vmem:[%s4697_s9] sm:$0xff] }
 0x601   :  { %v707_v40 = vmul.f32 1.442695, %v706_v37  ;;  %v973_v37 = vld [vmem:[%s4697_s9 + $0x8] sm:$0xff] }
 0x603   :  { %3790 = vpow2.f32 %v707_v40  ;;  %v3563_v40 = vpack.c.bf16 %v973_v37, %v972_v36 }
 0x60d   :  { %v3791_v41 = vpop.eup %3790 }
 0x60e   :  { %v709_v42 = vsel %vm56_vm0, %v3791_v41, 0.0 }
 0x60f   :  { %710 = vadd.xlane.f32.xlu1 %v709_v42  ;;  %v975_v42 = vld [vmem:[%s4697_s9 + $0x18] sm:$0xff] }
 0x69c   :  { %v711_v44 = vpop.xlane.xlu1 %710 }
 0x69d   :  { %v714_v48 = vmul.f32 1.0000001, %v711_v44  ;;  %v712_v49 = vmul.f32 1e-08, %v711_v44 }
 0x69f   :  { %3792 = vrcp.f32 %v714_v48  ;;  %v713_v51 = vadd.f32 %v3791_v41, %v712_v49  ;;  %v974_v41 = vld [vmem:[%s4697_s9 + $0x10] sm:$0xff] }
 0x6a0   :  { %v3566_v49 = vpack.c.bf16 %v975_v42, %v974_v41  ;;  %v4244_v42 = vld [vmem:[%s4698_s10] sm:$0xff] }
 0x6a9   :  { %v3793_v52 = vpop.eup %3792 }
 0x6aa   :  { %v716_v53 = vmul.f32 %v3793_v52, %v713_v51  ;;  %v976_v51 = vld [vmem:[%s4697_s9 + $0x20] sm:$0xff]  ;;  %v977_v52 = vld [vmem:[%s4697_s9 + $0x28] sm:$0xff] }
 0x6ac   :  { %v717_v54 = vsel %vm56_vm0, %v716_v53, -inf }
 0x6ad   :  { %718 = vmax.xlane.f32.xlu0 %v717_v54  ;;  %v978_v54 = vld [vmem:[%s4697_s9 + $0x30] sm:$0xff] }
 0x73a   :  { %v719_v55 = vpop.xlane.xlu0 %718 }
 0x73b   :  { %vm720_vm4 = vcmp.ge.f32.partialorder %v716_v53, %v719_v55  ;;  %v979_v55 = vld [vmem:[%s4697_s9 + $0x38] sm:$0xff] }
 0x73c   :  { %v721_v57 = vsel %vm720_vm4, -inf, %v716_v53 }
 0x73d   :  { %v722_v58 = vsel %vm56_vm0, %v721_v57, -inf }
 0x73e   :  { %723 = vmax.xlane.f32.xlu0 %v722_v58  ;;  %v980_v58 = vld [vmem:[%s4697_s9 + $0x40] sm:$0xff] }
 0x7cb   :  { %v724_v59 = vpop.xlane.xlu0 %723 }
 0x7cc   :  { %vm725_vm5 = vcmp.ge.f32.partialorder %v721_v57, %v724_v59  ;;  %v981_v59 = vld [vmem:[%s4697_s9 + $0x48] sm:$0xff] }
 0x7cd   :  { %v726_v2 = vsel %vm725_vm5, -inf, %v721_v57  ;;  %v3572_v57 = vpack.c.bf16 %v979_v55, %v978_v54 }
 0x7ce   :  { %v727_v9 = vsel %vm56_vm0, %v726_v2, -inf }
 0x7cf   :  { %728 = vmax.xlane.f32.xlu0 %v727_v9  ;;  %v982_v9 = vld [vmem:[%s4697_s9 + $0x50] sm:$0xff] }
 0x7e5   :  { %513 = vrot.lane.b32.xlu0 %v511_v11, %s3851_s4  ;;  %v983_v11 = vld [vmem:[%s4697_s9 + $0x58] sm:$0xff] }
 0x85c   :  { %v729_v12 = vpop.xlane.xlu0 %728 }
 0x85d   :  { %vm730_vm6 = vcmp.ge.f32.partialorder %v726_v2, %v729_v12  ;;  %v3578_v12 = vpack.c.bf16 %v983_v11, %v982_v9 }
 0x85e   :  { %v731_v35 = vsel %vm730_vm6, -inf, %v726_v2  ;;  %v3575_v2 = vpack.c.bf16 %v981_v59, %v980_v58  ;;  %vm1555_vm6 = vcmask 97312  }
 0x85f   :  { %v732_v13 = vsel %vm56_vm0, %v731_v35, -inf  ;;  %v984_v35 = vld [vmem:[%s4697_s9 + $0x60] sm:$0xff] }
 0x860   :  { %733 = vmax.xlane.f32.xlu0 %v732_v13  ;;  %v514_v14 = vpop.permute.xlu0 %513  ;;  %v985_v13 = vld [vmem:[%s4697_s9 + $0x68] sm:$0xff] }
 0x861   :  { %v516_v15 = vadd.f32 %v514_v14, %v4092_v7  ;;  %v517_v16 = vadd.f32 %v4086_v60, %v514_v14  ;;  %v346_v60 = vld [vmem:[%s4695_s7 + $0x28] sm:$0xff]  ;;  %v3581_v14 = vpack.c.bf16 %v985_v13, %v984_v35 }
 0x862   :  { %v3551_v29 = vpack.c.bf16 %v346_v60, %v345_v25 }
 0x863   :  { %v518_v18 = vmax.f32 %v516_v15, 0.0  ;;  %v519_v19 = vmax.f32 %v517_v16, 0.0  ;;  %v986_v15 = vld [vmem:[%s4697_s9 + $0x70] sm:$0xff]  ;;  %v987_v16 = vld [vmem:[%s4697_s9 + $0x78] sm:$0xff] }
 0x865   :  { %v3727_v20 = vpack.i.bf16 %v519_v19, %v518_v18  ;;  %v3584_v18 = vpack.c.bf16 %v987_v16, %v986_v15  ;;  %v3732_v19 = vpack.i.bf16 %v4024_v62, %v4019_v61 }
 0x867   :  { %3728 = vrot.lane.b32.xlu1 %v3727_v20, %s3851_s4  ;;  %v3737_v20 = vpack.i.bf16 %v4036_v1, %v4031_v0 }
 0x86b   :  { %3733 = vrot.lane.b32.xlu1 %v3732_v19, %s3846_s28 }
 0x86f   :  { %3738 = vrot.lane.b32.xlu1 %v3737_v20, %s3846_s28 }
 0x8d9   :  { %v3729_v21 = vpop.permute.xlu1 %3728 }
 0x8da   :  { %v3731_v22 = vunpack.i.h.bf16 %v3729_v21  ;;  %v3730_v23 = vunpack.i.l.bf16 %v3729_v21 }
 0x8dc   :  { %v3548_v24 = vpack.c.bf16 %v3731_v22, %v3730_v23 }
 0x8dd   :  { %v3734_v21 = vpop.permute.xlu1 %3733 }
 0x8de   :  { %3549 = vmatpush3.bf16.msra.mxu0 %v3548_v24  ;;  %v3736_v22 = vunpack.i.h.bf16 %v3734_v21  ;;  %v3735_v23 = vunpack.i.l.bf16 %v3734_v21 }
 0x8df   :  { %3550 = vmatprep.subr.bf16.mxu0 %v3847_v4 }
 0x8e0   :  { %v3587_v24 = vpack.c.bf16 %v3736_v22, %v3735_v23 }
 0x8e1   :  { %v3739_v25 = vpop.permute.xlu1 %3738 }
 0x8e2   :  { %3588 = vmatpush3.bf16.msra.mxu1 %v3587_v24 }
 0x8e3   :  { %3589 = vmatprep.subr.bf16.mxu1 %v3847_v4 }
 0x8ed   :  { %v734_v7 = vpop.xlane.xlu0 %733 }
 0x8ee   :  { %vm735_vm7 = vcmp.ge.f32.partialorder %v716_v53, %v734_v7  ;;  %v2958_v7 = vld [vmem:[%s4696_s8] ss:$0 sm:$0xff] }
 0x8ef   :  { %v2954_v27 = vsel %vm735_vm7, 1.0, %v3849_v5  ;;  %vm1566_vm7 = vcmask 162912  }
 0x8f0   :  { %v738_v30 = vmul.f32 %v2954_v27, %v716_v53  ;;  %v3569_v53 = vpack.c.bf16 %v977_v52, %v976_v51  ;;  %v3741_v27 = vunpack.i.h.bf16 %v3739_v25 }
 0x8f2   :  { %3252 = vmatmul.mubr.msk.f32.vlgmr.msra.gmra.mrb[8].mxu0 %vm56_vm0, %v738_v30 }
 0x8f3   :  { %3552 = vmatpush3.bf16.msra.mxu0 %v3551_v29  ;;  %3262 = vmatprep.mubr.msk.f32.mxu0 %vm3848_vm2, %v3849_v5  ;;  %v3740_v29 = vunpack.i.l.bf16 %v3739_v25 }
 0x8f4   :  { %3553 = vmatprep.subr.bf16.mxu0 %v3847_v4 }
 0x8f5   :  { %v3590_v0 = vpack.c.bf16 %v3741_v27, %v3740_v29 }
 0x8f7   :  { %3555 = vmatpush3.bf16.msra.mxu0 %v3554_v34  ;;  %3591 = vmatpush3.bf16.msra.mxu1 %v3590_v0 }
 0x8f8   :  { %3562 = vmatprep.subr.bf16.mxu0 %v3847_v4 }
 0x9c5   :  { %v816_v44 = vpop.f32.mrb[8].mxu0 }
 0x9c6   :  { %v3253_v48 = vpop.f32.mrb[9].mxu0  ;;  %3263 = vmatmul.mubr.msk.f32.vlgmr.msra.gmra.mrb[10].mxu0 %vm149_vm1, %v816_v44  ;;  %v4249_v44 = vld [vmem:[%s4698_s10 + $0x8] sm:$0xff] }
 0x9c7   :  { %3564 = vmatpush3.bf16.msra.mxu0 %v3563_v40  ;;  %3308 = vmatprep.mubr.msk.f32.mxu0 %vm3848_vm2, %v3849_v5  ;;  %v352_v48 = vld [vmem:[%s4698_s10 + $0x18] sm:$0xff] }
 0x9c8   :  { %3565 = vmatprep.subr.bf16.mxu0 %v3847_v4 }
 0x9cb   :  { %3567 = vmatpush3.bf16.msra.mxu0 %v3566_v49 }
 0x9cc   :  { %3568 = vmatprep.subr.bf16.mxu0 %v3847_v4 }
 0x9cf   :  { %3570 = vmatpush3.bf16.msra.mxu0 %v3569_v53 }
 0x9d0   :  { %3571 = vmatprep.subr.bf16.mxu0 %v3847_v4 }
 0x9d3   :  { %3573 = vmatpush3.bf16.msra.mxu0 %v3572_v57  ;;  %v1288_v57 = vrot.slane %v4138_v10, %v4055_v26 }
 0x9d4   :  { %3574 = vmatprep.subr.bf16.mxu0 %v3847_v4 }
 0x9d7   :  { %3576 = vmatpush3.bf16.msra.mxu0 %v3575_v2 }
 0x9d8   :  { %3577 = vmatprep.subr.bf16.mxu0 %v3847_v4 }
 0x9db   :  { %3579 = vmatpush3.bf16.msra.mxu0 %v3578_v12 }
 0x9dc   :  { %3580 = vmatprep.subr.bf16.mxu0 %v3847_v4 }
 0x9df   :  { %3582 = vmatpush3.bf16.msra.mxu0 %v3581_v14 }
 0x9e0   :  { %3583 = vmatprep.subr.bf16.mxu0 %v3847_v4 }
 0x9e3   :  { %3585 = vmatpush3.bf16.msra.mxu0 %v3584_v18 }
 0xa99   :  { %v889_v60 = vpop.f32.mrb[10].mxu0 }
 0xa9a   :  { %v960_v61 = vadd.f32 %v4129_v33, %v889_v60  ;;  %v3264_v62 = vpop.f32.mrb[11].mxu0 }
 0xa9c   :  { %v970_v1 = vadd.f32 %v2958_v7, %v960_v61 }
 0xa9e   :  { %v971_v30 = vmax.f32 %v970_v1, 0.0 }
 0xaa0   :  { %3309 = vmatmul.mubr.f32.vlgmr.msra.gmra.mrb[12].mxu0 %v971_v30  ;;  %v3742_v30 = vpack.i.bf16 %v4249_v44, %v4244_v42 }
 0xb73   :  { %v1058_v32 = vpop.f32.mrb[12].mxu0 }
 0xb74   :  { %v1059_v34 = vadd.f32 %v1058_v32, %v991_v31  ;;  %v3310_v36 = vpop.f32.mrb[13].mxu0 }
 0xb76   :  { %3320 = vmatmul.mubr.msk.f32.vlgmr.msra.gmra.mrb[6].mxu1 %vm149_vm1, %v1059_v34 }
 0xb77   :  { %3324 = vmatprep.mubr.msk.f32.mxu1 %vm149_vm1, %v4095_v8  ;;  %v3593_v8 = vpack.c.bf16 %v4249_v44, %v4244_v42 }
 0xc49   :  { %v1147_v33 = vpop.f32.mrb[6].mxu1 }
 0xc4a   :  { %v1148_v37 = vadd.f32 %v1147_v33, %v4047_v6  ;;  %v3321_v40 = vpop.f32.mrb[7].mxu1  ;;  %v351_v6 = vld [vmem:[%s4698_s10 + $0x10] sm:$0xff] }
 0xc4b   :  { %v3596_v49 = vpack.c.bf16 %v352_v48, %v351_v6  ;;  %v3747_v31 = vpack.i.bf16 %v352_v48, %v351_v6 }
 0xc4c   :  { %v1151_v41 = vmax.f32 %v1148_v37, 0.0 }
 0xc4e   :  { %3322 = vmatprep.subr.msk.mxu1 %vm149_vm1, %v1151_v41 }
 0xc4f   :  { %3323 = vmatpush3.xpose.msk.msra.mxu1 %vm149_vm1, %v1151_v41 }
 0xc50   :  { %3592 = vmatprep.subr.bf16.mxu1 %v3847_v4 }
 0xc52   :  { %3325 = vmatmul.mubr.msk.f32.vlgmr.msra.gmra.mrb[8].mxu1 %vm149_vm1, %v4089_v63 }
 0xc53   :  { %3594 = vmatpush3.bf16.msra.mxu1 %v3593_v8  ;;  %3335 = vmatprep.mubr.msk.f32.mxu1 %vm3848_vm2, %v3849_v5 }
 0xc54   :  { %3595 = vmatprep.subr.bf16.mxu1 %v3847_v4 }
 0xc57   :  { %3597 = vmatpush3.bf16.msra.mxu1 %v3596_v49 }
 0xc5a   :  { %3336 = vmatmul.mubr.msk.f32.vlgmr.msra.gmra.mrb[10].mxu1 %vm149_vm1, %v1059_v34 }
 0xd25   :  { %v3326_v51 = vpop.f32.mrb[8].mxu1 }
 0xd26   :  { %v4268_v52 = vmul.f32 0.17677669, %v3326_v51  ;;  %v1227_v53 = vpop.f32.mrb[9].mxu1 }
 0xd27   :  { %v4270_v54 = vmul.f32 0.17677669, %v1227_v53 }
 0xd28   :  { %v1242_v63 = vsel %vm1238_vm8, %v4268_v52, -inf }
 0xd29   :  { %1243 = vmax.xlane.f32.xlu0 %v1242_v63  ;;  %v1239_v55 = vsel %vm1238_vm8, %v4270_v54, -inf }
 0xd2a   :  { %1240 = vmax.xlane.f32.xlu1 %v1239_v55 }
 0xd2d   :  { %v1355_v58 = vpop.f32.mrb[10].mxu1 }
 0xd2e   :  { %v1356_v59 = vadd.f32 %v1355_v58, %v1288_v57  ;;  %v3337_v2 = vpop.f32.mrb[11].mxu1 }
 0xd2f   :  { %v4310_v2 = vld [vmem:[%s4693_s5 + $0x10] sm:$0xff] }
 0xd30   :  { %3338 = vmatprep.subr.mxu1 %v1356_v59 }
 0xd31   :  { %3339 = vmatpush3.msra.mxu1 %v1356_v59 }
 0xd3b   :  { %3748 = vrot.lane.b32.xlu1 %v3747_v31, %s3846_s28 }
 0xdb6   :  { %v1244_v9 = vpop.xlane.xlu0 %1243 }
 0xdb7   :  { %v1246_v11 = vsub.f32 %v4268_v52, %v1244_v9  ;;  %v1241_v12 = vpop.xlane.xlu1 %1240  ;;  %v1591_v9 = vmul.f32 1.442695, %v4310_v2 }
 0xdb8   :  { %v1245_v35 = vsub.f32 %v4270_v54, %v1241_v12  ;;  %v2988_v12 = vld [vmem:[%s4689_s1 + $0x8] sm:$0xff] }
 0xdb9   :  { %v1249_v13 = vmul.f32 1.442695, %v1246_v11  ;;  %v1447_v11 = vrot.slane %v4138_v10, %v4058_v28 }
 0xdba   :  { %v1247_v14 = vmul.f32 1.442695, %v1245_v35 }
 0xdbb   :  { %v3749_v37 = vpop.permute.xlu1 %3748 }
 0xdbc   :  { %3794 = vpow2.f32 %v1247_v14  ;;  %v3751_v42 = vunpack.i.h.bf16 %v3749_v37  ;;  %v3750_v44 = vunpack.i.l.bf16 %v3749_v37  ;;  %v1603_v14 = vrot.slane %v4310_v2, %v3990_v46 }
 0xdbd   :  { %3796 = vpow2.f32 %v1249_v13 }
 0xdbe   :  { %v3602_v51 = vpack.c.bf16 %v3751_v42, %v3750_v44 }
 0xdc6   :  { %v3795_v15 = vpop.eup %3794 }
 0xdc7   :  { %v1251_v16 = vsel %vm1238_vm8, %v3795_v15, 0.0  ;;  %v3797_v18 = vpop.eup %3796 }
 0xdc8   :  { %1252 = vadd.xlane.f32.xlu0 %v1251_v16  ;;  %v1254_v19 = vsel %vm1238_vm8, %v3797_v18, 0.0 }
 0xdcc   :  { %1255 = vadd.xlane.f32.xlu0 %v1254_v19 }
 0xe55   :  { %v1253_v20 = vpop.xlane.xlu0 %1252 }
 0xe56   :  { %3798 = vrcp.f32 %v1253_v20 }
 0xe59   :  { %v1256_v21 = vpop.xlane.xlu0 %1255 }
 0xe5a   :  { %3800 = vrcp.f32 %v1256_v21 }
 0xe5b   :  { %3802 = vpow2.f32 %v1591_v9 }
 0xe60   :  { %v3799_v22 = vpop.eup %3798 }
 0xe61   :  { %v1259_v23 = vmul.f32 %v3799_v22, %v3795_v15 }
 0xe63   :  { %v1261_v24 = vsel %vm1238_vm8, %v1259_v23, -inf }
 0xe64   :  { %v3801_v25 = vpop.eup %3800  ;;  %1262 = vmax.xlane.f32.xlu0 %v1261_v24 }
 0xe65   :  { %v1260_v60 = vmul.f32 %v3801_v25, %v3797_v18 }
 0xe67   :  { %v1264_v7 = vsel %vm1238_vm8, %v1260_v60, -inf }
 0xe68   :  { %1265 = vmax.xlane.f32.xlu0 %v1264_v7 }
 0xef1   :  { %v1263_v27 = vpop.xlane.xlu0 %1262 }
 0xef2   :  { %vm1267_vm9 = vcmp.ge.f32.partialorder %v1259_v23, %v1263_v27 }
 0xef3   :  { %v1269_v29 = vsel %vm1267_vm9, -inf, %v1259_v23  ;;  %vm2803_vm9 = vcmask 228512  }
 0xef4   :  { %v1271_v61 = vsel %vm1238_vm8, %v1269_v29, -inf }
 0xef5   :  { %1272 = vmax.xlane.f32.xlu0 %v1271_v61  ;;  %v1266_v62 = vpop.xlane.xlu0 %1265  ;;  %v4349_v61 = vld [vmem:[%s4694_s6 + $0x20] sm:$0xff] }
 0xef6   :  { %vm1268_vm10 = vcmp.ge.f32.partialorder %v1260_v60, %v1266_v62  ;;  %v4354_v62 = vld [vmem:[%s4694_s6 + $0x28] sm:$0xff] }
 0xef7   :  { %v1270_v0 = vsel %vm1268_vm10, -inf, %v1260_v60  ;;  %vm2814_vm10 = vcmask 294112  }
 0xef8   :  { %v1274_v1 = vsel %vm1238_vm8, %v1270_v0, -inf  ;;  %v3606_v0 = vpack.c.bf16 %v4354_v62, %v4349_v61 }
 0xef9   :  { %1275 = vmax.xlane.f32.xlu0 %v1274_v1  ;;  %v4361_v1 = vld [vmem:[%s4694_s6 + $0x30] sm:$0xff] }
 0xefa   :  { %3607 = vmatprep.subr.bf16.mxu0 %v3606_v0 }
 0xefb   :  { %3609 = vmatpush3.bf16.msra.mxu0 %v3606_v0 }
 0xf0f   :  { %3743 = vrot.lane.b32.xlu0 %v3742_v30, %s3846_s28  ;;  %v4366_v30 = vld [vmem:[%s4694_s6 + $0x38] sm:$0xff]  ;;  %s2924_s6 = sshll.u32 %s3856_s3, 4  ;;  %s2925_s6 = int_to_ptr.vmem [resolvable:$true] %s2924_s6 }
 0xf10   :  { %v3610_v31 = vpack.c.bf16 %v4366_v30, %v4361_v1  ;;  %p3827_p1 = scmp.lt.s32.totalorder %s2925_s6, %s2925_s6 }
 0xf12   :  { %3611 = vmatprep.subr.bf16.mxu0 %v3610_v31 }
 0xf13   :  { %3613 = vmatpush3.bf16.msra.mxu0 %v3610_v31 }
 0xf14   :  { %3620 = vmatprep.subr.bf16.mxu0 %v3847_v4 }
 0xf82   :  { %v1273_v32 = vpop.xlane.xlu0 %1272 }
 0xf83   :  { %vm1277_vm11 = vcmp.ge.f32.partialorder %v1259_v23, %v1273_v32  ;;  %v4376_v32 = vrot.slane %v4310_v2, %v498_v3 }
 0xf84   :  { %v2963_v34 = vsel %vm1277_vm11, 1.0, %v3849_v5 }
 0xf85   :  { %v4291_v36 = vmul.f32 %v2963_v34, %v1259_v23 }
 0xf86   :  { %v1276_v33 = vpop.xlane.xlu0 %1275 }
 0xf87   :  { %vm1278_vm12 = vcmp.ge.f32.partialorder %v1260_v60, %v1276_v33  ;;  %3340 = vmatprep.mubr.msk.f32.mxu1 %vm1238_vm8, %v4291_v36 }
 0xf88   :  { %v2964_v40 = vsel %vm1278_vm12, 1.0, %v3849_v5 }
 0xf89   :  { %v4296_v41 = vmul.f32 %v2964_v40, %v1260_v60 }
 0xf8a   :  { %v3744_v8 = vpop.permute.xlu0 %3743 }
 0xf8b   :  { %3341 = vmatmul.mubr.msk.f32.vlgmr.msra.gmra.mrb[12].mxu1 %vm1238_vm8, %v4296_v41  ;;  %v3746_v6 = vunpack.i.h.bf16 %v3744_v8  ;;  %v3745_v48 = vunpack.i.l.bf16 %v3744_v8 }
 0xf8d   :  { %v3598_v49 = vpack.c.bf16 %v3746_v6, %v3745_v48 }
 0xf8f   :  { %3599 = vmatprep.subr.bf16.mxu1 %v3598_v49 }
 0xf90   :  { %3601 = vmatpush3.bf16.msra.mxu1 %v3598_v49 }
 0xf91   :  { %3603 = vmatprep.subr.bf16.mxu1 %v3602_v51 }
 0xf94   :  { %3605 = vmatpush3.bf16.msra.mxu1 %v3602_v51 }
 0xf95   :  { %3614 = vmatprep.subr.bf16.mxu1 %v3847_v4 }
0x105e   :  { %v3342_v53 = vpop.f32.mrb[12].mxu1 }
0x105f   :  { %v1441_v63 = vadd.f32 %v3342_v53, %v3986_v43  ;;  %v1431_v55 = vpop.f32.mrb[13].mxu1  ;;  %v3803_v43 = vpop.eup %3802 }
0x1060   :  { %v1440_v57 = vadd.f32 %v1431_v55, %v3992_v47  ;;  %v1598_v47 = vrot.slane %v3803_v43, %v3981_v39 }
0x1061   :  { %v1443_v59 = vmax.f32 %v1441_v63, 0.0 }
0x1062   :  { %v1442_v58 = vmax.f32 %v1440_v57, 0.0  ;;  %v1599_v13 = vmul.f32 %v2988_v12, %v1598_v47  ;;  %v1638_v12 = vrot.slane %v4310_v2, %v4055_v26 }
0x1064   :  { %3351 = vmatprep.mubr.msk.f32.mxu1 %vm149_vm1, %v1442_v58  ;;  %v4325_v21 = vadd.f32 %v1603_v14, %v1599_v13 }
0x1065   :  { %3352 = vmatmul.mubr.msk.f32.vlgmr.msra.gmra.mrb[14].mxu1 %vm149_vm1, %v1443_v59 }
0x1066   :  { %3373 = vmatprep.mubr.msk.f32.mxu1 %vm3848_vm2, %v3849_v5  ;;  %v1762_v60 = vmul.f32 %v4325_v21, %v4325_v21  ;;  %v1758_v27 = vsel %vm149_vm1, %v4325_v21, 0.0  ;;  %3616 = vmatpush3.bf16.msra.mxu1 %v3606_v0 }
0x1067   :  { %3617 = vmatprep.subr.bf16.mxu1 %v3847_v4 }
0x1068   :  { %v1763_v29 = vsel %vm149_vm1, %v1762_v60, 0.0 }
0x106a   :  { %3619 = vmatpush3.bf16.msra.mxu1 %v3610_v31 }
0x106b   :  { %3624 = vmatprep.subr.bf16.mxu1 %v3847_v4 }
0x1138   :  { %v3353_v35 = vpop.f32.mrb[14].mxu1 }
0x1139   :  { %v1542_v15 = vadd.f32 %v3353_v35, %v1447_v11  ;;  %v1536_v16 = vpop.f32.mrb[15].mxu1 }
0x113a   :  { %v1537_v18 = vadd.f32 %v1536_v16, %v1447_v11  ;;  %v1644_v16 = vrot.slane %v4310_v2, %v4058_v28 }
0x113b   :  { %v4321_v19 = vmax.f32 %v1542_v15, 0.0 }
0x113c   :  { %v4323_v20 = vmax.f32 %v1537_v18, 0.0 }
0x113d   :  { %1548 = vst.msk [vmem:[#allocation2 + $0x8] sm:$0xff] %vm149_vm1, %v4321_v19  ;;  %v1608_v10 = vsel %vm149_vm1, %v4321_v19, 0.0  ;;  %v1614_v24 = vmul.f32 %v4321_v19, %v4321_v19 }
0x113e   :  { %1547 = vst.msk [vmem:[#allocation2] sm:$0xff] %vm149_vm1, %v4323_v20  ;;  %1609 = vadd.xlane.f32.xlu0 %v1608_v10  ;;  %v1605_v22 = vsel %vm149_vm1, %v4323_v20, 0.0  ;;  %v1613_v23 = vmul.f32 %v4323_v20, %v4323_v20 }
0x113f   :  { %1606 = vadd.xlane.f32.xlu1 %v1605_v22  ;;  %v1618_v7 = vsel %vm149_vm1, %v1614_v24, 0.0 }
0x1140   :  { %v1615_v25 = vsel %vm149_vm1, %v1613_v23, 0.0 }
0x1142   :  { %1616 = vadd.xlane.f32.xlu0 %v1615_v25  ;;  %v1776_v25 = vrot.slane %v4310_v2, %v537_v45  ;;  %v1731_v45 = vrot.slane %v4310_v2, %v492_v56 }
0x1143   :  { %1619 = vadd.xlane.f32.xlu1 %v1618_v7 }
0x1146   :  { %1759 = vadd.xlane.f32.xlu0 %v1758_v27 }
0x1147   :  { %1764 = vadd.xlane.f32.xlu1 %v1763_v29  ;;  %v1781_v29 = vrot.slane %v4310_v2, %v542_v50 }
0x115c   :  { %1739 = vrot.lane.b32.xlu0 %v4376_v32, %s3850_s27 }
0x11cb   :  { %v1610_v34 = vpop.xlane.xlu0 %1609 }
0x11cc   :  { %v1607_v33 = vpop.xlane.xlu1 %1606  ;;  %v1612_v37 = vmul.f32 0.03125, %v1610_v34 }
0x11cd   :  { %v1611_v40 = vmul.f32 0.03125, %v1607_v33 }
0x11ce   :  { %v1624_v48 = vmul.f32 %v1612_v37, %v1612_v37  ;;  %v1628_v13 = vsub.f32 %v4321_v19, %v1612_v37 }
0x11cf   :  { %v1623_v42 = vmul.f32 %v1611_v40, %v1611_v40  ;;  %v1617_v44 = vpop.xlane.xlu0 %1616  ;;  %v1627_v11 = vsub.f32 %v4323_v20, %v1611_v40 }
0x11d0   :  { %v1621_v8 = vmul.f32 0.03125, %v1617_v44  ;;  %v1620_v6 = vpop.xlane.xlu1 %1619 }
0x11d1   :  { %v1622_v49 = vmul.f32 0.03125, %v1620_v6 }
0x11d2   :  { %v1625_v51 = vsub.f32 %v1621_v8, %v1623_v42 }
0x11d3   :  { %v1626_v53 = vsub.f32 %v1622_v49, %v1624_v48  ;;  %v1760_v63 = vpop.xlane.xlu0 %1759 }
0x11d4   :  { %v1629_v55 = vadd.f32 1e-05, %v1625_v51  ;;  %v1761_v57 = vmul.f32 0.03125, %v1760_v63  ;;  %v1765_v3 = vpop.xlane.xlu1 %1764  ;;  %v2976_v63 = vld [vmem:[%s4695_s7 + $0x40] sm:$0xff] }
0x11d5   :  { %v1630_v58 = vadd.f32 1e-05, %v1626_v53  ;;  %v1766_v59 = vmul.f32 0.03125, %v1765_v3 }
0x11d6   :  { %3804 = vrsqrt.f32 %v1629_v55  ;;  %v1767_v9 = vmul.f32 %v1761_v57, %v1761_v57  ;;  %v1769_v22 = vsub.f32 %v4325_v21, %v1761_v57  ;;  %v2977_v55 = vld [vmem:[%s4695_s7 + $0x48] sm:$0xff] }
0x11d7   :  { %3806 = vrsqrt.f32 %v1630_v58  ;;  %v1740_v31 = vpop.permute.xlu0 %1739  ;;  %v3634_v57 = vpack.c.bf16 %v2977_v55, %v2976_v63  ;;  %v2978_v58 = vld [vmem:[%s4695_s7 + $0x50] sm:$0xff] }
0x11d8   :  { %v1768_v43 = vsub.f32 %v1766_v59, %v1767_v9  ;;  %v3637_v59 = vpack.c.bf16 %v2979_v17, %v2978_v58 }
0x11da   :  { %v1770_v47 = vadd.f32 1e-05, %v1768_v43 }
0x11dc   :  { %3808 = vrsqrt.f32 %v1770_v47 }
0x11e0   :  { %v3805_v35 = vpop.eup %3804 }
0x11e1   :  { %v3807_v14 = vpop.eup %3806  ;;  %v1633_v15 = vmul.f32 %v3805_v35, %v1627_v11 }
0x11e2   :  { %v1634_v18 = vmul.f32 %v3807_v14, %v1628_v13 }
0x11e3   :  { %v1639_v10 = vmul.f32 %v1638_v12, %v1633_v15 }
0x11e4   :  { %v1640_v23 = vmul.f32 %v1638_v12, %v1634_v18 }
0x11e5   :  { %v1645_v24 = vadd.f32 %v1644_v16, %v1639_v10 }
0x11e6   :  { %v3809_v60 = vpop.eup %3808  ;;  %v1646_v7 = vadd.f32 %v1644_v16, %v1640_v23 }
0x11e7   :  { %3362 = vmatprep.mubr.msk.f32.mxu0 %vm149_vm1, %v1645_v24  ;;  %v1772_v27 = vmul.f32 %v3809_v60, %v1769_v22 }
0x11e8   :  { %3363 = vmatmul.mubr.msk.f32.vlgmr.msra.gmra.mrb[14].mxu0 %vm149_vm1, %v1646_v7 }
0x11e9   :  { %v1777_v0 = vmul.f32 %v1776_v25, %v1772_v27  ;;  %3380 = vmatprep.mubr.msk.f32.mxu0 %vm3848_vm2, %v3849_v5 }
0x11eb   :  { %v1782_v21 = vadd.f32 %v1781_v29, %v1777_v0 }
0x11ed   :  { %3374 = vmatmul.mubr.msk.f32.vlgmr.msra.gmra.mrb[16].mxu1 %vm149_vm1, %v1782_v21 }
0x11ee   :  { %3387 = vmatprep.mubr.msk.f32.mxu1 %vm3848_vm2, %v3849_v5 }
0x12bb   :  { %v4403_v34 = vpop.f32.mrb[14].mxu0 }
0x12bc   :  { %v4406_v50 = vadd.f32 %v4403_v34, %v1731_v45  ;;  %v1743_v33 = vadd.f32 %v4403_v34, %v1740_v31  ;;  %v4409_v37 = vpop.f32.mrb[15].mxu0 }
0x12bd   :  { %v4412_v40 = vadd.f32 %v1731_v45, %v4409_v37  ;;  %v1742_v42 = vadd.f32 %v1740_v31, %v4409_v37 }
0x12be   :  { %v1745_v44 = vmax.f32 %v1743_v33, 0.0 }
0x12bf   :  { %v1744_v8 = vmax.f32 %v1742_v42, 0.0 }
0x12c0   :  { %v1852_v38 = vpop.f32.mrb[16].mxu1 }
0x12c1   :  { %v3752_v6 = vpack.i.bf16 %v1745_v44, %v1744_v8  ;;  %v3375_v56 = vpop.f32.mrb[17].mxu1  ;;  %v1853_v53 = vadd.f32 %v1852_v38, %v1731_v45 }
0x12c3   :  { %3753 = vrot.lane.b32.xlu1 %v3752_v6, %s3846_s28  ;;  %v1856_v3 = vmax.f32 %v1853_v53, 0.0 }
0x1335   :  { %v3754_v2 = vpop.permute.xlu1 %3753 }
0x1336   :  { %v3756_v48 = vunpack.i.h.bf16 %v3754_v2  ;;  %v3755_v49 = vunpack.i.l.bf16 %v3754_v2 }
0x1338   :  { %v3621_v51 = vpack.c.bf16 %v3756_v48, %v3755_v49 }
0x133a   :  { %3623 = vmatpush3.bf16.xpose.msk.msra.mxu0 %vm4101_vm3, %v3621_v51 }
0x133b   :  { %3633 = vmatprep.subr.bf16.mxu0 %v3847_v4 }
0x1341   :  { %3381 = vmatmul.mubr.msk.f32.vlgmr.msra.gmra.mrb[16].mxu0 %vm149_vm1, %v1856_v3 }
0x1342   :  { %3635 = vmatpush3.bf16.msra.mxu0 %v3634_v57  ;;  %3409 = vmatprep.mubr.msk.f32.mxu0 %vm3848_vm2, %v3849_v5 }
0x1343   :  { %3636 = vmatprep.subr.bf16.mxu0 %v3847_v4 }
0x1346   :  { %3638 = vmatpush3.bf16.msra.mxu0 %v3637_v59  ;;  %v2982_v59 = vld [vmem:[%s4695_s7 + $0x70] sm:$0xff] }
0x1347   :  { %3663 = vmatprep.subr.bf16.mxu0 %v3847_v4 }
0x1349   :  { %3410 = vmatmul.mubr.msk.f32.vlgmr.msra.gmra.mrb[18].mxu0 %vm149_vm1, %v1782_v21  ;;  %v4448_v21 = vld [vmem:[%s4693_s5 + $0x18] sm:$0xf] }
0x134a   :  { %3455 = vmatprep.mubr.msk.f32.mxu0 %vm3848_vm2, %v3849_v5  ;;  %v1749_v45 = vrot.slane %v4448_v21, %v3990_v46 }
0x1414   :  { %v1936_v9 = vpop.f32.mrb[16].mxu0 }
0x1415   :  { %v1940_v43 = vmul.f32 0.17677669, %v1936_v9  ;;  %v3382_v47 = vpop.f32.mrb[17].mxu0  ;;  %v2983_v9 = vld [vmem:[%s4695_s7 + $0x78] sm:$0xff] }
0x1416   :  { %v3001_v47 = vld [vmem:[%s4697_s9 + $0x80] sm:$0xff] }
0x1417   :  { %v1941_v11 = vsel %vm56_vm0, %v1940_v43, -inf }
0x1418   :  { %1942 = vmax.xlane.f32.xlu1 %v1941_v11  ;;  %v3002_v11 = vld [vmem:[%s4697_s9 + $0x88] sm:$0xff] }
0x141c   :  { %v4440_v12 = vpop.f32.mrb[18].mxu0 }
0x141d   :  { %v3411_v35 = vpop.f32.mrb[19].mxu0 }
0x141e   :  { %v3640_v35 = vpack.c.bf16 %v3002_v11, %v3001_v47  ;;  %v4555_v11 = vld [vmem:[%s4698_s10 + $0x20] sm:$0xff] }
0x14a5   :  { %v1943_v13 = vpop.xlane.xlu1 %1942 }
0x14a6   :  { %v1944_v14 = vsub.f32 %v1940_v43, %v1943_v13  ;;  %v3631_v43 = vpack.c.bf16 %v2983_v9, %v2982_v59  ;;  %v3003_v13 = vld [vmem:[%s4697_s9 + $0x90] sm:$0xff] }
0x14a8   :  { %v1945_v15 = vmul.f32 1.442695, %v1944_v14  ;;  %v3004_v14 = vld [vmem:[%s4697_s9 + $0x98] sm:$0xff] }
0x14aa   :  { %3810 = vpow2.f32 %v1945_v15 }
0x14b4   :  { %v3811_v16 = vpop.eup %3810 }
0x14b5   :  { %v1947_v18 = vsel %vm56_vm0, %v3811_v16, 0.0 }
0x14b6   :  { %1948 = vadd.xlane.f32.xlu0 %v1947_v18  ;;  %v3643_v18 = vpack.c.bf16 %v3004_v14, %v3003_v13 }
0x1543   :  { %v1949_v10 = vpop.xlane.xlu0 %1948 }
0x1544   :  { %v1952_v22 = vmul.f32 1.0000001, %v1949_v10  ;;  %v1950_v23 = vmul.f32 1e-08, %v1949_v10  ;;  %v3005_v10 = vld [vmem:[%s4697_s9 + $0xa0] sm:$0xff] }
0x1546   :  { %3812 = vrcp.f32 %v1952_v22  ;;  %v1951_v24 = vadd.f32 %v3811_v16, %v1950_v23  ;;  %v3006_v22 = vld [vmem:[%s4697_s9 + $0xa8] sm:$0xff] }
0x1547   :  { %v3646_v23 = vpack.c.bf16 %v3006_v22, %v3005_v10 }
0x1550   :  { %v3813_v25 = vpop.eup %3812 }
0x1551   :  { %v1954_v60 = vmul.f32 %v3813_v25, %v1951_v24  ;;  %v3007_v24 = vld [vmem:[%s4697_s9 + $0xb0] sm:$0xff]  ;;  %v3008_v25 = vld [vmem:[%s4697_s9 + $0xb8] sm:$0xff] }
0x1553   :  { %v1955_v7 = vsel %vm56_vm0, %v1954_v60, -inf }
0x1554   :  { %1956 = vmax.xlane.f32.xlu0 %v1955_v7  ;;  %v3009_v7 = vld [vmem:[%s4697_s9 + $0xc0] sm:$0xff] }
0x15e1   :  { %v1957_v27 = vpop.xlane.xlu0 %1956 }
0x15e2   :  { %vm1958_vm13 = vcmp.ge.f32.partialorder %v1954_v60, %v1957_v27  ;;  %v3010_v27 = vld [vmem:[%s4697_s9 + $0xc8] sm:$0xff] }
0x15e3   :  { %v1959_v29 = vsel %vm1958_vm13, -inf, %v1954_v60 }
0x15e4   :  { %v1960_v0 = vsel %vm56_vm0, %v1959_v29, -inf }
0x15e5   :  { %1961 = vmax.xlane.f32.xlu1 %v1960_v0  ;;  %v3011_v0 = vld [vmem:[%s4697_s9 + $0xd0] sm:$0xff] }
0x15f6   :  { %1751 = vrot.lane.b32.xlu1 %v1749_v45, %s3851_s4  ;;  %v3012_v45 = vld [vmem:[%s4697_s9 + $0xd8] sm:$0xff] }
0x1672   :  { %v1962_v31 = vpop.xlane.xlu1 %1961 }
0x1673   :  { %vm1963_vm14 = vcmp.ge.f32.partialorder %v1959_v29, %v1962_v31  ;;  %v3655_v31 = vpack.c.bf16 %v3012_v45, %v3011_v0 }
0x1674   :  { %v1964_v33 = vsel %vm1963_vm14, -inf, %v1959_v29  ;;  %v3652_v29 = vpack.c.bf16 %v3010_v27, %v3009_v7 }
0x1675   :  { %v1965_v42 = vsel %vm56_vm0, %v1964_v33, -inf }
0x1676   :  { %1966 = vmax.xlane.f32.xlu0 %v1965_v42  ;;  %v1752_v44 = vpop.permute.xlu1 %1751  ;;  %v3014_v42 = vld [vmem:[%s4697_s9 + $0xe8] sm:$0xff] }
0x1677   :  { %v1754_v8 = vadd.f32 %v1752_v44, %v4409_v37  ;;  %v1755_v38 = vadd.f32 %v4403_v34, %v1752_v44  ;;  %v2980_v34 = vld [vmem:[%s4695_s7 + $0x60] sm:$0xff]  ;;  %v2981_v37 = vld [vmem:[%s4695_s7 + $0x68] sm:$0xff]  ;;  %s3822_s7 = scalar_lea.vmem %s2925_s6, 256 }
0x1678   :  { %v3628_v58 = vpack.c.bf16 %v2981_v37, %v2980_v34  ;;  %p3823_p0 = scmp.ne.s32.totalorder %s2925_s6, %s3822_s7  ;;  %p3828_p2 = scmp.lt.s32.totalorder %s3822_s7, %s3822_s7 }
0x1679   :  { %v1756_v6 = vmax.f32 %v1754_v8, 0.0  ;;  %v1757_v56 = vmax.f32 %v1755_v38, 0.0  ;;  %v3015_v8 = vld [vmem:[%s4697_s9 + $0xf0] sm:$0xff]  ;;  %v3016_v38 = vld [vmem:[%s4697_s9 + $0xf8] sm:$0xff] }
0x167a   :  { %p3829_p3 = por %p3828_p2, %p3827_p1 }
0x167b   :  { %v3757_v2 = vpack.i.bf16 %v1757_v56, %v1756_v6  ;;  %v3661_v6 = vpack.c.bf16 %v3016_v38, %v3015_v8  ;;  %v3762_v56 = vpack.i.bf16 %v4354_v62, %v4349_v61 }
0x167c   :  { %p3830_p4 = pnand %p3829_p3, %p3823_p0 }
0x167d   :  { %3763 = vrot.lane.b32.xlu1 %v3762_v56, %s3846_s28 }
0x1703   :  { %v1967_v48 = vpop.xlane.xlu0 %1966 }
0x1704   :  { %vm1968_vm15 = vcmp.ge.f32.partialorder %v1964_v33, %v1967_v48  ;;  %v3764_v48 = vpop.permute.xlu1 %3763 }
0x1705   :  { %v1969_v49 = vsel %vm1968_vm15, -inf, %v1964_v33  ;;  %v3013_v33 = vld [vmem:[%s4697_s9 + $0xe0] sm:$0xff]  ;;  %s3854_s9 = smov 20  }
0x1706   :  { %v1970_v46 = vsel %vm56_vm0, %v1969_v49, -inf  ;;  %v3658_v44 = vpack.c.bf16 %v3014_v42, %v3013_v33  ;;  %v3766_v49 = vunpack.i.h.bf16 %v3764_v48 }
0x1707   :  { %1971 = vmax.xlane.f32.xlu0 %v1970_v46  ;;  %v3765_v46 = vunpack.i.l.bf16 %v3764_v48 }
0x171d   :  { %3758 = vrot.lane.b32.xlu0 %v3757_v2, %s3851_s4  ;;  %v3767_v2 = vpack.i.bf16 %v4366_v30, %v4361_v1 }
0x171f   :  { %3768 = vrot.lane.b32.xlu1 %v3767_v2, %s3846_s28 }
0x1794   :  { %v1972_v51 = vpop.xlane.xlu0 %1971 }
0x1795   :  { %vm1973_vm3 = vcmp.ge.f32.partialorder %v1954_v60, %v1972_v51  ;;  %v3664_v51 = vpack.c.bf16 %v3766_v49, %v3765_v46 }
0x1796   :  { %v2995_v57 = vsel %vm1973_vm3, 1.0, %v3849_v5 }
0x1797   :  { %v1976_v17 = vmul.f32 %v2995_v57, %v1954_v60  ;;  %v3649_v60 = vpack.c.bf16 %v3008_v25, %v3007_v24  ;;  %3665 = vmatpush3.bf16.msra.mxu0 %v3664_v51 }
0x1798   :  { %v3759_v53 = vpop.permute.xlu0 %3758  ;;  %3666 = vmatprep.subr.bf16.mxu0 %v3847_v4 }
0x1799   :  { %v3761_v63 = vunpack.i.h.bf16 %v3759_v53  ;;  %v3760_v55 = vunpack.i.l.bf16 %v3759_v53  ;;  %v3769_v53 = vpop.permute.xlu1 %3768 }
0x179a   :  { %v3771_v34 = vunpack.i.h.bf16 %v3769_v53  ;;  %v3770_v37 = vunpack.i.l.bf16 %v3769_v53 }
0x179b   :  { %v3625_v3 = vpack.c.bf16 %v3761_v63, %v3760_v55  ;;  %v3000_v55 = vld [vmem:[%s4696_s8 + $0x1] ss:$0 sm:$0xff]  ;;  %s3855_s8 = smov 28  }
0x179c   :  { %v3667_v1 = vpack.c.bf16 %v3771_v34, %v3770_v37 }
0x179d   :  { %3626 = vmatpush3.bf16.msra.mxu1 %v3625_v3  ;;  %v2231_v3 = vrot.slane %v4448_v21, %v3981_v39  ;;  %v4560_v39 = vld [vmem:[%s4698_s10 + $0x28] sm:$0xff] }
0x179e   :  { %3627 = vmatprep.subr.bf16.mxu1 %v3847_v4  ;;  %3668 = vmatpush3.bf16.msra.mxu0 %v3667_v1  ;;  %v3772_v34 = vpack.i.bf16 %v4560_v39, %v4555_v11 }
0x17a0   :  { %3388 = vmatmul.mubr.msk.f32.vlgmr.msra.gmra.mrb[18].mxu1 %vm56_vm0, %v1976_v17 }
0x17a1   :  { %3629 = vmatpush3.bf16.msra.mxu1 %v3628_v58  ;;  %3398 = vmatprep.mubr.msk.f32.mxu1 %vm3848_vm2, %v3849_v5 }
0x17a2   :  { %3630 = vmatprep.subr.bf16.mxu1 %v3847_v4 }
0x17a5   :  { %3632 = vmatpush3.bf16.msra.mxu1 %v3631_v43 }
0x17a6   :  { %3639 = vmatprep.subr.bf16.mxu1 %v3847_v4 }
0x1873   :  { %v2054_v15 = vpop.f32.mrb[18].mxu1 }
0x1874   :  { %v3389_v16 = vpop.f32.mrb[19].mxu1  ;;  %3399 = vmatmul.mubr.msk.f32.vlgmr.msra.gmra.mrb[20].mxu1 %vm149_vm1, %v2054_v15 }
0x1875   :  { %3641 = vmatpush3.bf16.msra.mxu1 %v3640_v35  ;;  %3444 = vmatprep.mubr.msk.f32.mxu1 %vm3848_vm2, %v3849_v5  ;;  %v2987_v35 = vld [vmem:[%s4698_s10 + $0x38] sm:$0xff] }
0x1876   :  { %3642 = vmatprep.subr.bf16.mxu1 %v3847_v4 }
0x1879   :  { %3644 = vmatpush3.bf16.msra.mxu1 %v3643_v18 }
0x187a   :  { %3645 = vmatprep.subr.bf16.mxu1 %v3847_v4 }
0x187d   :  { %3647 = vmatpush3.bf16.msra.mxu1 %v3646_v23 }
0x187e   :  { %3648 = vmatprep.subr.bf16.mxu1 %v3847_v4 }
0x1881   :  { %3650 = vmatpush3.bf16.msra.mxu1 %v3649_v60 }
0x1882   :  { %3651 = vmatprep.subr.bf16.mxu1 %v3847_v4 }
0x1885   :  { %3653 = vmatpush3.bf16.msra.mxu1 %v3652_v29 }
0x1886   :  { %3654 = vmatprep.subr.bf16.mxu1 %v3847_v4 }
0x1889   :  { %3656 = vmatpush3.bf16.msra.mxu1 %v3655_v31 }
0x188a   :  { %3657 = vmatprep.subr.bf16.mxu1 %v3847_v4 }
0x188d   :  { %3659 = vmatpush3.bf16.msra.mxu1 %v3658_v44 }
0x188e   :  { %3660 = vmatprep.subr.bf16.mxu1 %v3847_v4 }
0x1891   :  { %3662 = vmatpush3.bf16.msra.mxu1 %v3661_v6 }
0x1947   :  { %v2127_v63 = vpop.f32.mrb[20].mxu1 }
0x1948   :  { %v2198_v61 = vadd.f32 %v4440_v12, %v2127_v63  ;;  %v3400_v62 = vpop.f32.mrb[21].mxu1 }
0x194a   :  { %v2209_v30 = vadd.f32 %v3000_v55, %v2198_v61 }
0x194c   :  { %v2210_v57 = vmax.f32 %v2209_v30, 0.0 }
0x194e   :  { %3445 = vmatmul.mubr.f32.vlgmr.msra.gmra.mrb[22].mxu1 %v2210_v57 }
0x1a21   :  { %v2298_v58 = vpop.f32.mrb[22].mxu1 }
0x1a22   :  { %v2299_v17 = vadd.f32 %v2298_v58, %v2231_v3  ;;  %v3446_v59 = vpop.f32.mrb[23].mxu1 }
0x1a24   :  { %3456 = vmatmul.mubr.msk.f32.vlgmr.msra.gmra.mrb[20].mxu0 %vm149_vm1, %v2299_v17 }
0x1a25   :  { %3460 = vmatprep.mubr.msk.f32.mxu0 %vm149_vm1, %v4412_v40  ;;  %v3670_v40 = vpack.c.bf16 %v4560_v39, %v4555_v11 }
0x1af7   :  { %v2387_v12 = vpop.f32.mrb[20].mxu0 }
0x1af8   :  { %v2388_v9 = vadd.f32 %v2387_v12, %v4376_v32  ;;  %v3457_v43 = vpop.f32.mrb[21].mxu0  ;;  %v2986_v32 = vld [vmem:[%s4698_s10 + $0x30] sm:$0xff] }
0x1af9   :  { %v3673_v13 = vpack.c.bf16 %v2987_v35, %v2986_v32  ;;  %v3777_v37 = vpack.i.bf16 %v2987_v35, %v2986_v32 }
0x1afa   :  { %v2391_v47 = vmax.f32 %v2388_v9, 0.0 }
0x1afc   :  { %3458 = vmatprep.subr.msk.mxu0 %vm149_vm1, %v2391_v47 }
0x1afd   :  { %3459 = vmatpush3.xpose.msk.msra.mxu0 %vm149_vm1, %v2391_v47 }
0x1afe   :  { %3669 = vmatprep.subr.bf16.mxu0 %v3847_v4 }
0x1b00   :  { %3461 = vmatmul.mubr.msk.f32.vlgmr.msra.gmra.mrb[22].mxu0 %vm149_vm1, %v4406_v50 }
0x1b01   :  { %3671 = vmatpush3.bf16.msra.mxu0 %v3670_v40  ;;  %3471 = vmatprep.mubr.msk.f32.mxu0 %vm3848_vm2, %v3849_v5 }
0x1b02   :  { %3672 = vmatprep.subr.bf16.mxu0 %v3847_v4  ;;  %v2527_v4 = vrot.slane %v4448_v21, %v4055_v26 }
0x1b05   :  { %3674 = vmatpush3.bf16.msra.mxu0 %v3673_v13 }
0x1b08   :  { %3472 = vmatmul.mubr.msk.f32.vlgmr.msra.gmra.mrb[24].mxu0 %vm149_vm1, %v2299_v17 }
0x1bd3   :  { %v3462_v14 = vpop.f32.mrb[22].mxu0 }
0x1bd4   :  { %v4579_v15 = vmul.f32 0.17677669, %v3462_v14  ;;  %v2467_v16 = vpop.f32.mrb[23].mxu0  ;;  %v2819_v14 = vld [vmem:[%s4699_s11] sm:$0xff] }
0x1bd5   :  { %v4581_v18 = vmul.f32 0.17677669, %v2467_v16  ;;  %v2820_v16 = vld [vmem:[%s4699_s11 + $0x8] sm:$0xff] }
0x1bd6   :  { %v2481_v10 = vsel %vm1238_vm8, %v4579_v15, -inf }
0x1bd7   :  { %2482 = vmax.xlane.f32.xlu0 %v2481_v10  ;;  %v2478_v50 = vsel %vm1238_vm8, %v4581_v18, -inf  ;;  %v3683_v10 = vpack.c.bf16 %v2820_v16, %v2819_v14 }
0x1bd8   :  { %2479 = vmax.xlane.f32.xlu1 %v2478_v50 }
0x1bd9   :  { %3684 = vmatprep.subr.bf16.mxu1 %v3683_v10 }
0x1bda   :  { %3686 = vmatpush3.bf16.msra.mxu1 %v3683_v10 }
0x1bdb   :  { %v2594_v22 = vpop.f32.mrb[24].mxu0 }
0x1bdc   :  { %v2595_v23 = vadd.f32 %v2594_v22, %v2527_v4  ;;  %v3473_v24 = vpop.f32.mrb[25].mxu0  ;;  %v2823_v4 = vld [vmem:[%s4699_s11 + $0x20] sm:$0xff]  ;;  %v2824_v22 = vld [vmem:[%s4699_s11 + $0x28] sm:$0xff] }
0x1bdd   :  { %v2825_v24 = vld [vmem:[%s4699_s11 + $0x30] sm:$0xff] }
0x1bde   :  { %3474 = vmatprep.subr.mxu0 %v2595_v23 }
0x1bdf   :  { %3475 = vmatpush3.msra.mxu0 %v2595_v23  ;;  %v3691_v23 = vpack.c.bf16 %v2824_v22, %v2823_v4 }
0x1c64   :  { %v2483_v25 = vpop.xlane.xlu0 %2482 }
0x1c65   :  { %v2485_v60 = vsub.f32 %v4579_v15, %v2483_v25  ;;  %v2480_v7 = vpop.xlane.xlu1 %2479  ;;  %v2826_v25 = vld [vmem:[%s4699_s11 + $0x38] sm:$0xff] }
0x1c66   :  { %v2484_v27 = vsub.f32 %v4581_v18, %v2480_v7  ;;  %v2686_v7 = vrot.slane %v4448_v21, %v4058_v28 }
0x1c67   :  { %v2488_v29 = vmul.f32 1.442695, %v2485_v60  ;;  %v3695_v60 = vpack.c.bf16 %v2826_v25, %v2825_v24 }
0x1c68   :  { %v2486_v0 = vmul.f32 1.442695, %v2484_v27 }
0x1c69   :  { %3814 = vpow2.f32 %v2488_v29 }
0x1c6a   :  { %3816 = vpow2.f32 %v2486_v0 }
0x1c73   :  { %v3815_v45 = vpop.eup %3814 }
0x1c74   :  { %v3817_v31 = vpop.eup %3816  ;;  %v2493_v33 = vsel %vm1238_vm8, %v3815_v45, 0.0 }
0x1c75   :  { %2494 = vadd.xlane.f32.xlu1 %v2493_v33  ;;  %v2490_v26 = vsel %vm1238_vm8, %v3817_v31, 0.0 }
0x1c76   :  { %2491 = vadd.xlane.f32.xlu0 %v2490_v26 }
0x1d02   :  { %v2495_v42 = vpop.xlane.xlu1 %2494 }
0x1d03   :  { %3818 = vrcp.f32 %v2495_v42  ;;  %v2492_v44 = vpop.xlane.xlu0 %2491 }
0x1d04   :  { %3820 = vrcp.f32 %v2492_v44 }
0x1d0d   :  { %v3819_v8 = vpop.eup %3818 }
0x1d0e   :  { %v3821_v38 = vpop.eup %3820  ;;  %v2499_v6 = vmul.f32 %v3819_v8, %v3815_v45 }
0x1d0f   :  { %v2498_v56 = vmul.f32 %v3821_v38, %v3817_v31 }
0x1d10   :  { %v2503_v2 = vsel %vm1238_vm8, %v2499_v6, -inf }
0x1d11   :  { %2504 = vmax.xlane.f32.xlu1 %v2503_v2  ;;  %v2500_v48 = vsel %vm1238_vm8, %v2498_v56, -inf }
0x1d12   :  { %2501 = vmax.xlane.f32.xlu0 %v2500_v48 }
0x1d9e   :  { %v2505_v49 = vpop.xlane.xlu1 %2504 }
0x1d9f   :  { %vm2507_vm0 = vcmp.ge.f32.partialorder %v2499_v6, %v2505_v49  ;;  %v2502_v46 = vpop.xlane.xlu0 %2501 }
0x1da0   :  { %vm2506_vm2 = vcmp.ge.f32.partialorder %v2498_v56, %v2502_v46  ;;  %v2509_v51 = vsel %vm2507_vm0, -inf, %v2499_v6 }
0x1da1   :  { %v2513_v53 = vsel %vm1238_vm8, %v2509_v51, -inf  ;;  %v2508_v63 = vsel %vm2506_vm2, -inf, %v2498_v56 }
0x1da2   :  { %2514 = vmax.xlane.f32.xlu1 %v2513_v53  ;;  %v2510_v55 = vsel %vm1238_vm8, %v2508_v63, -inf }
0x1da3   :  { %2511 = vmax.xlane.f32.xlu0 %v2510_v55 }
0x1db3   :  { %3778 = vrot.lane.b32.xlu1 %v3777_v37, %s3846_s28 }
0x1db9   :  { %3773 = vrot.lane.b32.xlu0 %v3772_v34, %s3846_s28 }
0x1e2f   :  { %v2515_v61 = vpop.xlane.xlu1 %2514 }
0x1e30   :  { %vm2517_vm4 = vcmp.ge.f32.partialorder %v2499_v6, %v2515_v61  ;;  %v2512_v62 = vpop.xlane.xlu0 %2511 }
0x1e31   :  { %v3022_v1 = vsel %vm2517_vm4, 1.0, %v3849_v5  ;;  %vm2516_vm5 = vcmp.ge.f32.partialorder %v2498_v56, %v2512_v62 }
0x1e32   :  { %v3021_v30 = vsel %vm2516_vm5, 1.0, %v3849_v5  ;;  %v2523_v58 = vmul.f32 %v3022_v1, %v2499_v6 }
0x1e33   :  { %v2522_v57 = vmul.f32 %v3021_v30, %v2498_v56  ;;  %v3779_v3 = vpop.permute.xlu1 %3778 }
0x1e34   :  { %v3774_v17 = vpop.permute.xlu0 %3773  ;;  %v3781_v59 = vunpack.i.h.bf16 %v3779_v3  ;;  %v3780_v12 = vunpack.i.l.bf16 %v3779_v3 }
0x1e35   :  { %3476 = vmatprep.mubr.msk.f32.mxu0 %vm1238_vm8, %v2522_v57  ;;  %v3776_v9 = vunpack.i.h.bf16 %v3774_v17  ;;  %v3775_v43 = vunpack.i.l.bf16 %v3774_v17 }
0x1e36   :  { %3477 = vmatmul.mubr.msk.f32.vlgmr.msra.gmra.mrb[26].mxu0 %vm1238_vm8, %v2523_v58  ;;  %v3679_v11 = vpack.c.bf16 %v3781_v59, %v3780_v12  ;;  %vm2834_vm8 = vcmask 523264  }
0x1e37   :  { %v3675_v47 = vpack.c.bf16 %v3776_v9, %v3775_v43 }
0x1e39   :  { %3676 = vmatprep.subr.bf16.mxu0 %v3675_v47 }
0x1e3a   :  { %3678 = vmatpush3.bf16.msra.mxu0 %v3675_v47 }
0x1e3b   :  { %3680 = vmatprep.subr.bf16.mxu0 %v3679_v11 }
0x1e3e   :  { %3682 = vmatpush3.bf16.msra.mxu0 %v3679_v11 }
0x1f09   :  { %v3478_v39 = vpop.f32.mrb[26].mxu0 }
0x1f0a   :  { %v2680_v5 = vadd.f32 %v3478_v39, %v4321_v19  ;;  %v2670_v40 = vpop.f32.mrb[27].mxu0  ;;  %v2821_v19 = vld [vmem:[%s4699_s11 + $0x10] sm:$0xff] }
0x1f0b   :  { %v2679_v32 = vadd.f32 %v2670_v40, %v4323_v20  ;;  %v2822_v20 = vld [vmem:[%s4699_s11 + $0x18] sm:$0xff]  ;;  %s3853_s11 = smov 12  }
0x1f0c   :  { %v2682_v13 = vmax.f32 %v2680_v5, 0.0  ;;  %v3687_v50 = vpack.c.bf16 %v2822_v20, %v2821_v19 }
0x1f0d   :  { %v2681_v35 = vmax.f32 %v2679_v32, 0.0 }
0x1f0e   :  { %3688 = vmatprep.subr.bf16.mxu1 %v3687_v50 }
0x1f0f   :  { %3487 = vmatprep.mubr.msk.f32.mxu0 %vm149_vm1, %v2681_v35  ;;  %3690 = vmatpush3.bf16.msra.mxu1 %v3687_v50 }
0x1f10   :  { %3488 = vmatmul.mubr.msk.f32.vlgmr.msra.gmra.mrb[28].mxu0 %vm149_vm1, %v2682_v13  ;;  %3692 = vmatprep.subr.bf16.mxu1 %v3691_v23  ;;  %vm2794_vm1 = vcmask 523520  }
0x1f13   :  { %3694 = vmatpush3.bf16.msra.mxu1 %v3691_v23 }
0x1f14   :  { %3696 = vmatprep.subr.bf16.mxu1 %v3695_v60 }
0x1f17   :  { %3698 = vmatpush3.bf16.msra.mxu1 %v3695_v60 }
0x1fe3   :  { %v3489_v27 = vpop.f32.mrb[28].mxu0 }
0x1fe4   :  { %v2781_v29 = vadd.f32 %v3489_v27, %v2686_v7  ;;  %v2775_v0 = vpop.f32.mrb[29].mxu0 }
0x1fe5   :  { %v2776_v45 = vadd.f32 %v2775_v0, %v2686_v7 }
0x1fe6   :  { %v2785_v31 = vmax.f32 %v2781_v29, 0.0 }
0x1fe7   :  { %v2784_v33 = vmax.f32 %v2776_v45, 0.0 }
0x1fe8   :  { %2790 = vrot.lane.b32.xlu0 %v2785_v31, %s3850_s27 }
0x1fe9   :  { %2788 = vrot.lane.b32.xlu1 %v2784_v33, %s3850_s27 }
0x1fec   :  { %1551 = vrot.lane.b32.xlu0 %v4296_v41, %s3852_s19 }
0x1fed   :  { %1549 = vrot.lane.b32.xlu1 %v4291_v36, %s3852_s19 }
0x1ff0   :  { %1562 = vrot.lane.b32.xlu0 %v4268_v52, %s3853_s11 }
0x1ff1   :  { %1560 = vrot.lane.b32.xlu1 %v4270_v54, %s3853_s11 }
0x1ff4   :  { %2799 = vrot.lane.b32.xlu0 %v2523_v58, %s3854_s9 }
0x1ff5   :  { %2797 = vrot.lane.b32.xlu1 %v2522_v57, %s3854_s9 }
0x1ff8   :  { %2810 = vrot.lane.b32.xlu0 %v4579_v15, %s3855_s8 }
0x1ff9   :  { %2808 = vrot.lane.b32.xlu1 %v4581_v18, %s3855_s8 }
0x205a   :  { %v2791_v28 = vpop.permute.xlu0 %2790 }
0x205b   :  { %2796 = vst.msk [vmem:[#allocation2 + $0x8] sm:$0xff] %vm2794_vm1, %v2791_v28  ;;  %v2789_v21 = vpop.permute.xlu1 %2788 }
0x205c   :  { %2795 = vst.msk [vmem:[#allocation2] sm:$0xff] %vm2794_vm1, %v2789_v21 }
0x205e   :  { %v1552_v36 = vpop.permute.xlu0 %1551 }
0x205f   :  { %1557 = vst.msk [vmem:[%s4702_s14 + $0x8] sm:$0xff] %vm1555_vm6, %v1552_v36  ;;  %v1550_v52 = vpop.permute.xlu1 %1549 }
0x2060   :  { %1556 = vst.msk [vmem:[%s4702_s14] sm:$0xff] %vm1555_vm6, %v1550_v52 }
0x2062   :  { %v1563_v54 = vpop.permute.xlu0 %1562  ;;  %v2818_v18 = vld [vmem:[#allocation2 + $0x8] sm:$0xff] }
0x2063   :  { %1568 = vst.msk [vmem:[%s4702_s14 + $0x8] sm:$0xff] %vm1566_vm7, %v1563_v54  ;;  %v1561_v41 = vpop.permute.xlu1 %1560  ;;  %v2817_v15 = vld [vmem:[#allocation2] sm:$0xff] }
0x2064   :  { %1567 = vst.msk [vmem:[%s4702_s14] sm:$0xff] %vm1566_vm7, %v1561_v41  ;;  %3506 = vmatprep.mubr.msk.f32.mxu1 %vm2834_vm8, %v2817_v15 }
0x2065   :  { %3507 = vmatmul.mubr.msk.f32.vlgmr.msra.gmra.mrb[24].mxu1 %vm2834_vm8, %v2818_v18 }
0x2066   :  { %v2800_v26 = vpop.permute.xlu0 %2799 }
0x2067   :  { %2805 = vst.msk [vmem:[%s4702_s14 + $0x8] sm:$0xff] %vm2803_vm9, %v2800_v26  ;;  %v2798_v42 = vpop.permute.xlu1 %2797 }
0x2068   :  { %2804 = vst.msk [vmem:[%s4702_s14] sm:$0xff] %vm2803_vm9, %v2798_v42 }
0x206a   :  { %v2811_v44 = vpop.permute.xlu0 %2810 }
0x206b   :  { %2816 = vst.msk [vmem:[%s4702_s14 + $0x8] sm:$0xff] %vm2814_vm10, %v2811_v44  ;;  %v2809_v8 = vpop.permute.xlu1 %2808 }
0x206c   :  { %2815 = vst.msk [vmem:[%s4702_s14] sm:$0xff] %vm2814_vm10, %v2809_v8 }
0x206d   :  { %3833 = shalt.err (!%p3830_p4)
}
0x206e   :  { %s3834_s16 = scalar_lea.hbm %s4701_s13, 256 }
0x206f   :  { %p3835_p5 = scmp.ne.s32.totalorder %s4701_s13, %s3834_s16  ;;  %p3838_p6 = scmp.lt.u32.totalorder %s3834_s16, %s4701_s13 }
0x2071   :  { %p3840_p7 = pnand %p3838_p6, %p3835_p5 }
0x2073   :  { %3843 = shalt.err (!%p3840_p7)
}
0x2074   :  { %s3857_s9 = smov 128   ;;  %s3858_s8 = smov 8   ;;  %v3028_v38 = vld [vmem:[%s4700_s12] ss:$0 sm:$0xff]  ;;  %vm2916_vm11 = vcmask 31744  }
0x2075   :  { %2930 = dma.vmem_to_hbm [thread:$0]  %s2925_s6, 256, %s4701_s13, [#allocation3], %s3857_s9, %s3857_s9, %s3858_s8  }
0x2138   :  { %v3508_v6 = vpop.f32.mrb[24].mxu1 }
0x2139   :  { %v2913_v56 = vadd.f32 %v3508_v6, %v3028_v38  ;;  %v2907_v2 = vpop.f32.mrb[25].mxu1 }
0x213a   :  { %v2908_v48 = vadd.f32 %v3028_v38, %v2907_v2 }
0x213b   :  { %2918 = vst.msk [vmem:[%s4702_s14 + $0x8] sm:$0xff] %vm2916_vm11, %v2913_v56 }
0x213c   :  { %2917 = vst.msk [vmem:[%s4702_s14] sm:$0xff] %vm2916_vm11, %v2908_v48 }
0x213d   :  { %3844 = dma.done.wait [#allocation3], 256  }
0x213e   :  { %3845 = vsyncadd [#allocation3], 4294967040 }
0x213f   :  { %2938 = vsyncpa [#allocation3], 1 }

</bundles_post_ra>
